<compile_context>
chip_gen: v7x
topology: tpu7x:2x2x1
jax: 0.10.0
libtpu: 0.0.40
codegen_flags: <defaults>
</compile_context>

<pallas_src>
import functools
import math
import numpy as np
import jax
import jax.numpy as jnp
from jax.experimental import pallas as pl
from jax.experimental.pallas import tpu as pltpu

REDUCE = 5
R3 = REDUCE ** 3          # 125
NEG_SLOPE = 0.01          # nn.LeakyReLU default
EPS = 1e-5                # InstanceNorm3d default eps


def _round_up(v, m):
    return ((v + m - 1) // m) * m


# --------------------- pass 1: per-batch statistics ---------------------
def _stats_kernel(S, x_ref, wc_ref, gamma_ref, beta_ref,
                  w1_ref, b1_ref, w2_ref, b2_ref,
                  ab_ref, sum_acc, gram_acc, max_acc):
    s_idx = pl.program_id(1)
    n_s = pl.num_programs(1)
    _, C, tile_s = x_ref.shape

    @pl.when(s_idx == 0)
    def _():
        sum_acc[...] = jnp.zeros_like(sum_acc)
        gram_acc[...] = jnp.zeros_like(gram_acc)
        max_acc[...] = jnp.full_like(max_acc, -jnp.inf)

    xb = x_ref[0].astype(jnp.bfloat16)                                          # (C, S_t)

    # channel sums via MXU ones-vector (f32 accumulation); Gram matrix via MXU.
    ones = jnp.ones((tile_s, 1), jnp.bfloat16)
    sum_acc[...] += jnp.dot(xb, ones, preferred_element_type=jnp.float32)       # (C, 1)
    gram_acc[...] += jax.lax.dot_general(
        xb, xb, (((1,), (1,)), ((), ())), preferred_element_type=jnp.float32)   # (C, C)

    # max pooling; mask lanes beyond the true spatial size (zero-padded tail).
    lane = jax.lax.broadcasted_iota(jnp.int32, (C, tile_s), 1)
    valid = (s_idx * tile_s + lane) < S
    xm = jnp.where(valid, xb.astype(jnp.float32), -jnp.inf)
    max_acc[...] = jnp.maximum(max_acc[...],
                               jnp.max(xm, axis=1, keepdims=True))              # (C, 1)

    @pl.when(s_idx == n_s - 1)
    def _():
        inv_s = 1.0 / S
        wcf = wc_ref[...].astype(jnp.float32)                                   # (R3, C)
        sum_x = sum_acc[...]                                                    # (C, 1)

        # InstanceNorm stats from channel sufficient statistics (no (125,S) temps).
        mu = jnp.dot(wcf, sum_x, preferred_element_type=jnp.float32) * inv_s    # (R3, 1)
        wG = jnp.dot(wcf, gram_acc[...], preferred_element_type=jnp.float32)    # (R3, C)
        ey2 = jnp.sum(wG * wcf, axis=1, keepdims=True) * inv_s                  # (R3, 1)
        var = jnp.maximum(ey2 - mu * mu, 0.0)
        rstd = jax.lax.rsqrt(var + EPS)
        scale = gamma_ref[...] * rstd
        shift = beta_ref[...] - mu * scale

        # shared MLP on stacked [avg | max] pooled vectors -> q, k, v.
        avg = sum_x * inv_s
        col_c = jax.lax.broadcasted_iota(jnp.int32, (C, 2), 1)
        pooled = jnp.where(col_c == 0, avg, max_acc[...])                       # (C, 2)
        h = jnp.maximum(
            jnp.dot(w1_ref[...], pooled, preferred_element_type=jnp.float32)
            + b1_ref[...], 0.0)
        o = jnp.dot(w2_ref[...], h, preferred_element_type=jnp.float32) + b2_ref[...]
        qk = jax.nn.sigmoid(o)                                                  # (R3, 2)
        q = qk[:, 0:1]                                                          # mlp(avgpool)
        k = qk[:, 1:2]                                                          # mlp(maxpool)
        v = jax.nn.sigmoid(q + k)

        # single-head attention (dim_head=1 -> scale=1): softmax(q k^T) @ v.
        scores = jax.lax.dot_general(
            q, k, (((1,), (1,)), ((), ())), preferred_element_type=jnp.float32) # (R3, R3)
        e = jnp.exp(scores - jnp.max(scores, axis=1, keepdims=True))
        sa = jnp.dot(e, v, preferred_element_type=jnp.float32) / jnp.sum(
            e, axis=1, keepdims=True)                                           # (R3, 1)

        # fold sa (> 0) into the InstanceNorm affine:
        #   leaky_relu(instnorm(y)) * sa == leaky_relu(y*(scale*sa) + shift*sa)
        col_o = jax.lax.broadcasted_iota(jnp.int32, (R3, 2), 1)
        ab_ref[0] = jnp.where(col_o == 0, scale * sa, shift * sa)               # (R3, 2)


# --------------------- pass 2: conv + folded norm / act / gate ---------------------
def _apply_kernel(x_ref, wc_ref, ab_ref, out_ref):
    xb = x_ref[0].astype(jnp.bfloat16)                                          # (C, S_t)
    y = jnp.dot(wc_ref[...], xb, preferred_element_type=jnp.float32)            # (R3, S_t)
    ab = ab_ref[0]                                                              # (R3, 2)
    z = y * ab[:, 0:1] + ab[:, 1:2]
    out_ref[0] = jnp.maximum(z, NEG_SLOPE * z).astype(out_ref.dtype)            # leaky_relu


# ------------------------------- wrapper -------------------------------
def channel_gate_wsa_v3(x, params, *, tile_s_target=4096):
    """ChannelGate_wSA_v3 forward.  x: (B, C, D, H, W) -> (B, 125, D, H, W) bf16."""
    B, C, D, H, W = x.shape
    S = D * H * W
    hid = params["w1"].shape[0]

    # spatial tiling: lane-dense tiles (multiples of 128)
    tile_s = min(_round_up(tile_s_target, 128), _round_up(S, 128))
    S_pad = _round_up(S, tile_s)
    n_s = S_pad // tile_s

    xr = x.reshape(B, C, S)
    if S_pad != S:
        # TODO(synk): zero-pad copy only happens when S % 128 != 0; a masked-store
        # tail tile would avoid this extra pass.
        xr = jnp.pad(xr, ((0, 0), (0, 0), (0, S_pad - S)))

    f32 = jnp.float32
    wc = params["wc"].astype(jnp.bfloat16)                  # MXU conv operand
    gamma = params["gamma"].reshape(R3, 1).astype(f32)
    beta = params["beta"].reshape(R3, 1).astype(f32)
    w1 = params["w1"].astype(f32)
    b1 = params["b1"].reshape(hid, 1).astype(f32)
    w2 = params["w2"].astype(f32)
    b2 = params["b2"].reshape(R3, 1).astype(f32)

    # generation-aware VMEM limit (~75% of physical: ~48 MiB v7x, 96 MiB v5e/v6e)
    try:
        cap = getattr(pltpu.get_tpu_info(), "vmem_capacity_bytes", 64 * 1024 * 1024)
    except Exception:
        cap = 64 * 1024 * 1024
    vmem_limit = min(int(0.75 * cap), 100 * 1024 * 1024)

    def rep(shape):
        n = len(shape)
        return pl.BlockSpec(shape, lambda b, s: (0,) * n)

    # ---- pass 1: per-batch folded affine (a, b) = (scale*sa, shift*sa) ----
    ab = pl.pallas_call(
        functools.partial(_stats_kernel, S),
        grid=(B, n_s),
        in_specs=[
            pl.BlockSpec((1, C, tile_s), lambda b, s: (b, 0, s)),
            rep((R3, C)), rep((R3, 1)), rep((R3, 1)),
            rep((hid, C)), rep((hid, 1)), rep((R3, hid)), rep((R3, 1)),
        ],
        out_specs=pl.BlockSpec((1, R3, 2), lambda b, s: (b, 0, 0)),
        out_shape=jax.ShapeDtypeStruct((B, R3, 2), jnp.float32),
        scratch_shapes=[pltpu.VMEM((C, 1), jnp.float32),
                        pltpu.VMEM((C, C), jnp.float32),
                        pltpu.VMEM((C, 1), jnp.float32)],
        compiler_params=pltpu.CompilerParams(
            dimension_semantics=("parallel", "arbitrary"),
            vmem_limit_bytes=vmem_limit),
    )(xr, wc, gamma, beta, w1, b1, w2, b2)

    # ---- pass 2: conv + folded InstanceNorm / LeakyReLU / gate, bf16 output ----
    if n_s > 2:
        # output writeback DMA is ~4x the input read -> deeper input buffering
        x_spec = pl.BlockSpec((1, C, tile_s), lambda b, s: (b, 0, s),
                              pipeline_mode=pl.Buffered(3))
    else:
        x_spec = pl.BlockSpec((1, C, tile_s), lambda b, s: (b, 0, s))

    out = pl.pallas_call(
        _apply_kernel,
        grid=(B, n_s),
        in_specs=[x_spec, rep((R3, C)),
                  pl.BlockSpec((1, R3, 2), lambda b, s: (b, 0, 0))],
        out_specs=pl.BlockSpec((1, R3, tile_s), lambda b, s: (b, 0, s)),
        out_shape=jax.ShapeDtypeStruct((B, R3, S_pad), jnp.bfloat16),
        compiler_params=pltpu.CompilerParams(
            dimension_semantics=("parallel", "parallel"),
            vmem_limit_bytes=vmem_limit),
    )(xr, wc, ab)

    if S_pad != S:
        out = out[..., :S]
    return out.reshape(B, R3, D, H, W)


# ------------------------- pure-JAX reference -------------------------
def reference(x, params):
    B, C, D, H, W = x.shape
    S = D * H * W
    xr = x.reshape(B, C, S).astype(jnp.float32)

    y = jnp.einsum('oc,bcs->bos', params["wc"].astype(jnp.float32), xr)
    mu = y.mean(-1, keepdims=True)
    var = ((y - mu) ** 2).mean(-1, keepdims=True)
    yn = (y - mu) / jnp.sqrt(var + EPS)
    yn = yn * params["gamma"][None, :, None] + params["beta"][None, :, None]
    y_re = jnp.where(yn >= 0, yn, NEG_SLOPE * yn)

    avg = xr.mean(-1)
    mx = xr.max(-1)

    def mlp(z):
        h = jnp.maximum(z @ params["w1"].T + params["b1"], 0.0)
        return jax.nn.sigmoid(h @ params["w2"].T + params["b2"])

    q = mlp(avg)
    k = mlp(mx)
    att = jax.nn.sigmoid(q + k)

    scores = q[:, :, None] * k[:, None, :]            # scale = 1.0
    p = jax.nn.softmax(scores, axis=-1)
    sa = jnp.einsum('bij,bj->bi', p, att)

    out = y_re * sa[:, :, None]
    return out.reshape(B, R3, D, H, W)


if __name__ == "__main__":
    key = jax.random.PRNGKey(0)
    # gate_channels=32, reduction_ratio=16, reduce_size=5; 8^3 volume -> S=512
    B, C, D, H, W = 4, 32, 8, 8, 8
    hid = C // 16
    ks = jax.random.split(key, 8)

    x = jax.random.normal(ks[0], (B, C, D, H, W), jnp.float32)
    params = dict(
        wc=0.1 * jax.random.normal(ks[1], (R3, C), jnp.float32),         # Conv3d 1x1x1, no bias
        gamma=1.0 + 0.1 * jax.random.normal(ks[2], (R3,), jnp.float32),  # InstanceNorm3d affine
        beta=0.1 * jax.random.normal(ks[3], (R3,), jnp.float32),
        w1=0.2 * jax.random.normal(ks[4], (hid, C), jnp.float32),        # Linear(C, C//16)
        b1=0.1 * jax.random.normal(ks[5], (hid,), jnp.float32),
        w2=0.2 * jax.random.normal(ks[6], (R3, hid), jnp.float32),       # Linear(C//16, 125)
        b2=0.1 * jax.random.normal(ks[7], (R3,), jnp.float32),
    )

    out = jax.block_until_ready(channel_gate_wsa_v3(x, params))
    assert out.shape == (B, R3, D, H, W)
    assert out.dtype == jnp.bfloat16

    with jax.default_matmul_precision("highest"):
        # Structural check: same computation with x / conv-weight pre-quantized to
        # bf16 and everything else f32 — isolates kernel bugs from dtype effects.
        xq = x.astype(jnp.bfloat16).astype(jnp.float32)
        params_q = dict(params, wc=params["wc"].astype(jnp.bfloat16).astype(jnp.float32))
        ref_q = jax.block_until_ready(reference(xq, params_q))
        # Module-semantics check: pure f32 reference; tolerance reflects the bf16
        # quantization of the MXU conv operands and of the stored output.
        ref = jax.block_until_ready(reference(x, params))

    out_f = np.asarray(out.astype(jnp.float32))
    np.testing.assert_allclose(out_f, np.asarray(ref_q), rtol=1e-2, atol=2e-3)
    np.testing.assert_allclose(out_f, np.asarray(ref), rtol=5e-2, atol=5e-2)
    print("KERNEL_OK")
</pallas_src>

<mosaic_0001>
module attributes {stable_mosaic.version = 11 : i64} {
  func.func @_stats_kernel(%arg0: i32, %arg1: i32, %arg2: memref<1x32x512xf32, #tpu.memory_space<vmem>>, %arg3: memref<125x32xbf16, #tpu.memory_space<vmem>>, %arg4: memref<125x1xf32, #tpu.memory_space<vmem>>, %arg5: memref<125x1xf32, #tpu.memory_space<vmem>>, %arg6: memref<2x32xf32, #tpu.memory_space<vmem>>, %arg7: memref<2x1xf32, #tpu.memory_space<vmem>>, %arg8: memref<125x2xf32, #tpu.memory_space<vmem>>, %arg9: memref<125x1xf32, #tpu.memory_space<vmem>>, %arg10: memref<1x125x2xf32, #tpu.memory_space<vmem>>, %arg11: memref<32x1xf32, #tpu.memory_space<vmem>>, %arg12: memref<32x32xf32, #tpu.memory_space<vmem>>, %arg13: memref<32x1xf32, #tpu.memory_space<vmem>>) attributes {dimension_semantics = [#tpu.dimension_semantics<parallel>, #tpu.dimension_semantics<arbitrary>], iteration_bounds = array<i64: 4, 1>, scalar_prefetch = 0 : i64, scratch_operands = 3 : i64, tpu.core_type = #tpu.core_type<tc>, window_params = [{transform_indices = @transform_0, window_bounds = array<i64: 1, 32, 512>}, {pipeline_mode = #tpu.pipeline_mode<synchronous>, transform_indices = @transform_1, window_bounds = array<i64: 125, 32>}, {pipeline_mode = #tpu.pipeline_mode<synchronous>, transform_indices = @transform_2, window_bounds = array<i64: 125, 1>}, {pipeline_mode = #tpu.pipeline_mode<synchronous>, transform_indices = @transform_3, window_bounds = array<i64: 125, 1>}, {pipeline_mode = #tpu.pipeline_mode<synchronous>, transform_indices = @transform_4, window_bounds = array<i64: 2, 32>}, {pipeline_mode = #tpu.pipeline_mode<synchronous>, transform_indices = @transform_5, window_bounds = array<i64: 2, 1>}, {pipeline_mode = #tpu.pipeline_mode<synchronous>, transform_indices = @transform_6, window_bounds = array<i64: 125, 2>}, {pipeline_mode = #tpu.pipeline_mode<synchronous>, transform_indices = @transform_7, window_bounds = array<i64: 125, 1>}, {transform_indices = @transform_8, window_bounds = array<i64: 1, 125, 2>}]} {
    %c0_i32 = arith.constant 0 : i32
    %0 = arith.cmpi eq, %arg1, %c0_i32 : i32
    %1 = arith.extui %0 : i1 to i32
    %c0_i32_0 = arith.constant 0 : i32
    %2 = arith.cmpi ne, %1, %c0_i32_0 : i32
    scf.if %2 {
      %cst_22 = arith.constant 0.000000e+00 : f32
      %32 = vector.broadcast %cst_22 : f32 to vector<32x1xf32>
      %c0_23 = arith.constant 0 : index
      %c0_24 = arith.constant 0 : index
      %33 = vector.load %arg11[%c0_23, %c0_24] : memref<32x1xf32, #tpu.memory_space<vmem>>, vector<32x1xf32>
      tpu.vector_store %arg11[%c0_23, %c0_24], %32 {strides = array<i32>} : memref<32x1xf32, #tpu.memory_space<vmem>>, vector<32x1xf32>,
      %cst_25 = arith.constant 0.000000e+00 : f32
      %34 = vector.broadcast %cst_25 : f32 to vector<32x32xf32>
      %c0_26 = arith.constant 0 : index
      %c0_27 = arith.constant 0 : index
      %35 = vector.load %arg12[%c0_26, %c0_27] : memref<32x32xf32, #tpu.memory_space<vmem>>, vector<32x32xf32>
      tpu.vector_store %arg12[%c0_26, %c0_27], %34 {strides = array<i32>} : memref<32x32xf32, #tpu.memory_space<vmem>>, vector<32x32xf32>,
      %cst_28 = arith.constant 0xFF800000 : f32
      %36 = vector.broadcast %cst_28 : f32 to vector<32x1xf32>
      %c0_29 = arith.constant 0 : index
      %c0_30 = arith.constant 0 : index
      %37 = vector.load %arg13[%c0_29, %c0_30] : memref<32x1xf32, #tpu.memory_space<vmem>>, vector<32x1xf32>
      tpu.vector_store %arg13[%c0_29, %c0_30], %36 {strides = array<i32>} : memref<32x1xf32, #tpu.memory_space<vmem>>, vector<32x1xf32>,
    } else {
    }
    %c0 = arith.constant 0 : index
    %c0_1 = arith.constant 0 : index
    %c0_2 = arith.constant 0 : index
    %3 = vector.load %arg2[%c0, %c0_1, %c0_2] : memref<1x32x512xf32, #tpu.memory_space<vmem>>, vector<1x32x512xf32>
    %4 = vector.shape_cast %3 : vector<1x32x512xf32> to vector<32x512xf32>
    %5 = arith.truncf %4 : vector<32x512xf32> to vector<32x512xbf16>
    %cst = arith.constant 1.000000e+00 : bf16
    %6 = vector.broadcast %cst : bf16 to vector<512x1xbf16>
    %c0_3 = arith.constant 0 : index
    %c0_4 = arith.constant 0 : index
    %7 = vector.load %arg11[%c0_3, %c0_4] : memref<32x1xf32, #tpu.memory_space<vmem>>, vector<32x1xf32>
    %cst_5 = arith.constant dense<0.000000e+00> : vector<32x1xf32>
    %8 = tpu.matmul %5, %6, %cst_5 {dimension_numbers = #tpu.dot_dimension_numbers<[1], [0], [0], [1], [0, 0, 1, 1], [], []>} : vector<32x512xbf16>, vector<512x1xbf16>, vector<32x1xf32> -> vector<32x1xf32>
    %9 = arith.addf %7, %8 : vector<32x1xf32>
    %c0_6 = arith.constant 0 : index
    %c0_7 = arith.constant 0 : index
    %10 = vector.load %arg11[%c0_6, %c0_7] : memref<32x1xf32, #tpu.memory_space<vmem>>, vector<32x1xf32>
    tpu.vector_store %arg11[%c0_6, %c0_7], %9 {strides = array<i32>} : memref<32x1xf32, #tpu.memory_space<vmem>>, vector<32x1xf32>,
    %c0_8 = arith.constant 0 : index
    %c0_9 = arith.constant 0 : index
    %11 = vector.load %arg12[%c0_8, %c0_9] : memref<32x32xf32, #tpu.memory_space<vmem>>, vector<32x32xf32>
    %cst_10 = arith.constant dense<0.000000e+00> : vector<32x32xf32>
    %12 = tpu.matmul %5, %5, %cst_10 {dimension_numbers = #tpu.dot_dimension_numbers<[1], [1], [0], [0], [0, 0, 1, 0], [], []>} : vector<32x512xbf16>, vector<32x512xbf16>, vector<32x32xf32> -> vector<32x32xf32>
    %13 = arith.addf %11, %12 : vector<32x32xf32>
    %c0_11 = arith.constant 0 : index
    %c0_12 = arith.constant 0 : index
    %14 = vector.load %arg12[%c0_11, %c0_12] : memref<32x32xf32, #tpu.memory_space<vmem>>, vector<32x32xf32>
    tpu.vector_store %arg12[%c0_11, %c0_12], %13 {strides = array<i32>} : memref<32x32xf32, #tpu.memory_space<vmem>>, vector<32x32xf32>,
    %15 = tpu.iota {dimensions = array<i32: 1>} : vector<32x512xi32>
    %c512_i32 = arith.constant 512 : i32
    %16 = arith.muli %arg1, %c512_i32 : i32
    %17 = vector.broadcast %16 : i32 to vector<32x512xi32>
    %18 = arith.addi %17, %15 : vector<32x512xi32>
    %c512_i32_13 = arith.constant 512 : i32
    %19 = vector.broadcast %c512_i32_13 : i32 to vector<32x512xi32>
    %20 = arith.cmpi slt, %18, %19 : vector<32x512xi32>
    %21 = arith.extf %5 : vector<32x512xbf16> to vector<32x512xf32>
    %cst_14 = arith.constant 0xFF800000 : f32
    %22 = vector.broadcast %cst_14 : f32 to vector<32x512xf32>
    %23 = arith.select %20, %21, %22 : vector<32x512xi1>, vector<32x512xf32>
    %c0_15 = arith.constant 0 : index
    %c0_16 = arith.constant 0 : index
    %24 = vector.load %arg13[%c0_15, %c0_16] : memref<32x1xf32, #tpu.memory_space<vmem>>, vector<32x1xf32>
    %cst_17 = arith.constant dense<0xFF800000> : vector<32xf32>
    %25 = vector.multi_reduction <maximumf>, %23, %cst_17 [1] : vector<32x512xf32> to vector<32xf32>
    %26 = vector.shape_cast %25 : vector<32xf32> to vector<32x1xf32>
    %27 = arith.maximumf %24, %26 : vector<32x1xf32>
    %c0_18 = arith.constant 0 : index
    %c0_19 = arith.constant 0 : index
    %28 = vector.load %arg13[%c0_18, %c0_19] : memref<32x1xf32, #tpu.memory_space<vmem>>, vector<32x1xf32>
    tpu.vector_store %arg13[%c0_18, %c0_19], %27 {strides = array<i32>} : memref<32x1xf32, #tpu.memory_space<vmem>>, vector<32x1xf32>,
    %c0_i32_20 = arith.constant 0 : i32
    %29 = arith.cmpi eq, %arg1, %c0_i32_20 : i32
    %30 = arith.extui %29 : i1 to i32
    %c0_i32_21 = arith.constant 0 : i32
    %31 = arith.cmpi ne, %30, %c0_i32_21 : i32
    scf.if %31 {
      %c0_22 = arith.constant 0 : index
      %c0_23 = arith.constant 0 : index
      %32 = vector.load %arg3[%c0_22, %c0_23] : memref<125x32xbf16, #tpu.memory_space<vmem>>, vector<125x32xbf16>
      %33 = arith.extf %32 : vector<125x32xbf16> to vector<125x32xf32>
      %c0_24 = arith.constant 0 : index
      %c0_25 = arith.constant 0 : index
      %34 = vector.load %arg11[%c0_24, %c0_25] : memref<32x1xf32, #tpu.memory_space<vmem>>, vector<32x1xf32>
      %cst_26 = arith.constant dense<0.000000e+00> : vector<125x1xf32>
      %35 = tpu.matmul %33, %34, %cst_26 {dimension_numbers = #tpu.dot_dimension_numbers<[1], [0], [0], [1], [0, 0, 1, 1], [], []>} : vector<125x32xf32>, vector<32x1xf32>, vector<125x1xf32> -> vector<125x1xf32>
      %cst_27 = arith.constant 0.001953125 : f32
      %36 = vector.broadcast %cst_27 : f32 to vector<125x1xf32>
      %37 = arith.mulf %35, %36 : vector<125x1xf32>
      %c0_28 = arith.constant 0 : index
      %c0_29 = arith.constant 0 : index
      %38 = vector.load %arg12[%c0_28, %c0_29] : memref<32x32xf32, #tpu.memory_space<vmem>>, vector<32x32xf32>
      %cst_30 = arith.constant dense<0.000000e+00> : vector<125x32xf32>
      %39 = tpu.matmul %33, %38, %cst_30 {dimension_numbers = #tpu.dot_dimension_numbers<[1], [0], [0], [1], [0, 0, 1, 1], [], []>} : vector<125x32xf32>, vector<32x32xf32>, vector<125x32xf32> -> vector<125x32xf32>
      %40 = arith.mulf %39, %33 : vector<125x32xf32>
      %cst_31 = arith.constant dense<0.000000e+00> : vector<125xf32>
      %41 = vector.multi_reduction <add>, %40, %cst_31 [1] : vector<125x32xf32> to vector<125xf32>
      %42 = vector.shape_cast %41 : vector<125xf32> to vector<125x1xf32>
      %cst_32 = arith.constant 0.001953125 : f32
      %43 = vector.broadcast %cst_32 : f32 to vector<125x1xf32>
      %44 = arith.mulf %42, %43 : vector<125x1xf32>
      %45 = arith.mulf %37, %37 : vector<125x1xf32>
      %46 = arith.subf %44, %45 : vector<125x1xf32>
      %cst_33 = arith.constant 0.000000e+00 : f32
      %47 = vector.broadcast %cst_33 : f32 to vector<125x1xf32>
      %48 = arith.maximumf %46, %47 : vector<125x1xf32>
      %cst_34 = arith.constant 9.99999974E-6 : f32
      %49 = vector.broadcast %cst_34 : f32 to vector<125x1xf32>
      %50 = arith.addf %48, %49 : vector<125x1xf32>
      %51 = math.rsqrt %50 : vector<125x1xf32>
      %c0_35 = arith.constant 0 : index
      %c0_36 = arith.constant 0 : index
      %52 = vector.load %arg4[%c0_35, %c0_36] : memref<125x1xf32, #tpu.memory_space<vmem>>, vector<125x1xf32>
      %53 = arith.mulf %52, %51 : vector<125x1xf32>
      %c0_37 = arith.constant 0 : index
      %c0_38 = arith.constant 0 : index
      %54 = vector.load %arg5[%c0_37, %c0_38] : memref<125x1xf32, #tpu.memory_space<vmem>>, vector<125x1xf32>
      %55 = arith.mulf %37, %53 : vector<125x1xf32>
      %56 = arith.subf %54, %55 : vector<125x1xf32>
      %cst_39 = arith.constant 0.001953125 : f32
      %57 = vector.broadcast %cst_39 : f32 to vector<32x1xf32>
      %58 = arith.mulf %34, %57 : vector<32x1xf32>
      %59 = tpu.iota {dimensions = array<i32: 1>} : vector<32x2xi32>
      %c0_i32_40 = arith.constant 0 : i32
      %60 = vector.broadcast %c0_i32_40 : i32 to vector<32x2xi32>
      %61 = arith.cmpi eq, %59, %60 : vector<32x2xi32>
      %c0_41 = arith.constant 0 : index
      %c0_42 = arith.constant 0 : index
      %62 = vector.load %arg13[%c0_41, %c0_42] : memref<32x1xf32, #tpu.memory_space<vmem>>, vector<32x1xf32>
      %63 = vector.shape_cast %58 : vector<32x1xf32> to vector<32x1xf32>
      %64 = vector.broadcast %63 : vector<32x1xf32> to vector<32x2xf32>
      %65 = vector.shape_cast %62 : vector<32x1xf32> to vector<32x1xf32>
      %66 = vector.broadcast %65 : vector<32x1xf32> to vector<32x2xf32>
      %67 = arith.select %61, %64, %66 : vector<32x2xi1>, vector<32x2xf32>
      %c0_43 = arith.constant 0 : index
      %c0_44 = arith.constant 0 : index
      %68 = vector.load %arg6[%c0_43, %c0_44] : memref<2x32xf32, #tpu.memory_space<vmem>>, vector<2x32xf32>
      %cst_45 = arith.constant dense<0.000000e+00> : vector<2x2xf32>
      %69 = tpu.matmul %68, %67, %cst_45 {dimension_numbers = #tpu.dot_dimension_numbers<[1], [0], [0], [1], [0, 0, 1, 1], [], []>} : vector<2x32xf32>, vector<32x2xf32>, vector<2x2xf32> -> vector<2x2xf32>
      %c0_46 = arith.constant 0 : index
      %c0_47 = arith.constant 0 : index
      %70 = vector.load %arg7[%c0_46, %c0_47] : memref<2x1xf32, #tpu.memory_space<vmem>>, vector<2x1xf32>
      %71 = vector.broadcast %70 : vector<2x1xf32> to vector<2x2xf32>
      %72 = arith.addf %69, %71 : vector<2x2xf32>
      %cst_48 = arith.constant 0.000000e+00 : f32
      %73 = vector.broadcast %cst_48 : f32 to vector<2x2xf32>
      %74 = arith.maximumf %72, %73 : vector<2x2xf32>
      %c0_49 = arith.constant 0 : index
      %c0_50 = arith.constant 0 : index
      %75 = vector.load %arg8[%c0_49, %c0_50] : memref<125x2xf32, #tpu.memory_space<vmem>>, vector<125x2xf32>
      %cst_51 = arith.constant dense<0.000000e+00> : vector<125x2xf32>
      %76 = tpu.matmul %75, %74, %cst_51 {dimension_numbers = #tpu.dot_dimension_numbers<[1], [0], [0], [1], [0, 0, 1, 1], [], []>} : vector<125x2xf32>, vector<2x2xf32>, vector<125x2xf32> -> vector<125x2xf32>
      %c0_52 = arith.constant 0 : index
      %c0_53 = arith.constant 0 : index
      %77 = vector.load %arg9[%c0_52, %c0_53] : memref<125x1xf32, #tpu.memory_space<vmem>>, vector<125x1xf32>
      %78 = vector.broadcast %77 : vector<125x1xf32> to vector<125x2xf32>
      %79 = arith.addf %76, %78 : vector<125x2xf32>
      %80 = arith.negf %79 : vector<125x2xf32>
      %81 = math.exp %80 : vector<125x2xf32>
      %cst_54 = arith.constant 1.000000e+00 : f32
      %82 = vector.broadcast %cst_54 : f32 to vector<125x2xf32>
      %83 = arith.addf %82, %81 : vector<125x2xf32>
      %84 = arith.divf %82, %83 : vector<125x2xf32>
      %85 = vector.extract_strided_slice %84 {offsets = [0, 0], sizes = [125, 1], strides = [1, 1]} : vector<125x2xf32> to vector<125x1xf32>
      %86 = vector.extract_strided_slice %84 {offsets = [0, 1], sizes = [125, 1], strides = [1, 1]} : vector<125x2xf32> to vector<125x1xf32>
      %87 = arith.addf %85, %86 : vector<125x1xf32>
      %88 = arith.negf %87 : vector<125x1xf32>
      %89 = math.exp %88 : vector<125x1xf32>
      %cst_55 = arith.constant 1.000000e+00 : f32
      %90 = vector.broadcast %cst_55 : f32 to vector<125x1xf32>
      %91 = arith.addf %90, %89 : vector<125x1xf32>
      %92 = arith.divf %90, %91 : vector<125x1xf32>
      %cst_56 = arith.constant dense<0.000000e+00> : vector<125x125xf32>
      %93 = tpu.matmul %85, %86, %cst_56 {dimension_numbers = #tpu.dot_dimension_numbers<[1], [1], [0], [0], [0, 0, 1, 0], [], []>} : vector<125x1xf32>, vector<125x1xf32>, vector<125x125xf32> -> vector<125x125xf32>
      %cst_57 = arith.constant dense<0xFF800000> : vector<125xf32>
      %94 = vector.multi_reduction <maximumf>, %93, %cst_57 [1] : vector<125x125xf32> to vector<125xf32>
      %95 = vector.shape_cast %94 : vector<125xf32> to vector<125x1xf32>
      %96 = vector.broadcast %95 : vector<125x1xf32> to vector<125x125xf32>
      %97 = arith.subf %93, %96 : vector<125x125xf32>
      %98 = math.exp %97 : vector<125x125xf32>
      %cst_58 = arith.constant dense<0.000000e+00> : vector<125x1xf32>
      %99 = tpu.matmul %98, %92, %cst_58 {dimension_numbers = #tpu.dot_dimension_numbers<[1], [0], [0], [1], [0, 0, 1, 1], [], []>} : vector<125x125xf32>, vector<125x1xf32>, vector<125x1xf32> -> vector<125x1xf32>
      %cst_59 = arith.constant dense<0.000000e+00> : vector<125xf32>
      %100 = vector.multi_reduction <add>, %98, %cst_59 [1] : vector<125x125xf32> to vector<125xf32>
      %101 = vector.shape_cast %100 : vector<125xf32> to vector<125x1xf32>
      %102 = arith.divf %99, %101 : vector<125x1xf32>
      %103 = tpu.iota {dimensions = array<i32: 1>} : vector<125x2xi32>
      %c0_i32_60 = arith.constant 0 : i32
      %104 = vector.broadcast %c0_i32_60 : i32 to vector<125x2xi32>
      %105 = arith.cmpi eq, %103, %104 : vector<125x2xi32>
      %106 = arith.mulf %53, %102 : vector<125x1xf32>
      %107 = arith.mulf %56, %102 : vector<125x1xf32>
      %108 = vector.shape_cast %106 : vector<125x1xf32> to vector<125x1xf32>
      %109 = vector.broadcast %108 : vector<125x1xf32> to vector<125x2xf32>
      %110 = vector.shape_cast %107 : vector<125x1xf32> to vector<125x1xf32>
      %111 = vector.broadcast %110 : vector<125x1xf32> to vector<125x2xf32>
      %112 = arith.select %105, %109, %111 : vector<125x2xi1>, vector<125x2xf32>
      %c0_61 = arith.constant 0 : index
      %c0_62 = arith.constant 0 : index
      %c0_63 = arith.constant 0 : index
      %113 = vector.load %arg10[%c0_61, %c0_62, %c0_63] : memref<1x125x2xf32, #tpu.memory_space<vmem>>, vector<1x125x2xf32>
      %114 = vector.shape_cast %113 : vector<1x125x2xf32> to vector<125x2xf32>
      %115 = vector.shape_cast %112 : vector<125x2xf32> to vector<1x125x2xf32>
      tpu.vector_store %arg10[%c0_61, %c0_62, %c0_63], %115 {strides = array<i32>} : memref<1x125x2xf32, #tpu.memory_space<vmem>>, vector<1x125x2xf32>,
    } else {
    }
    return
  }
  func.func @transform_0(%arg0: i32, %arg1: i32) -> (i32, i32, i32) {
    %c0_i32 = arith.constant 0 : i32
    %c0_i32_0 = arith.constant 0 : i32
    return %arg0, %c0_i32, %arg1 : i32, i32, i32
  }
  func.func @transform_1(%arg0: i32, %arg1: i32) -> (i32, i32) {
    %c0_i32 = arith.constant 0 : i32
    %c0_i32_0 = arith.constant 0 : i32
    %c0_i32_1 = arith.constant 0 : i32
    return %c0_i32, %c0_i32_0 : i32, i32
  }
  func.func @transform_2(%arg0: i32, %arg1: i32) -> (i32, i32) {
    %c0_i32 = arith.constant 0 : i32
    %c0_i32_0 = arith.constant 0 : i32
    %c0_i32_1 = arith.constant 0 : i32
    return %c0_i32, %c0_i32_0 : i32, i32
  }
  func.func @transform_3(%arg0: i32, %arg1: i32) -> (i32, i32) {
    %c0_i32 = arith.constant 0 : i32
    %c0_i32_0 = arith.constant 0 : i32
    %c0_i32_1 = arith.constant 0 : i32
    return %c0_i32, %c0_i32_0 : i32, i32
  }
  func.func @transform_4(%arg0: i32, %arg1: i32) -> (i32, i32) {
    %c0_i32 = arith.constant 0 : i32
    %c0_i32_0 = arith.constant 0 : i32
    %c0_i32_1 = arith.constant 0 : i32
    return %c0_i32, %c0_i32_0 : i32, i32
  }
  func.func @transform_5(%arg0: i32, %arg1: i32) -> (i32, i32) {
    %c0_i32 = arith.constant 0 : i32
    %c0_i32_0 = arith.constant 0 : i32
    %c0_i32_1 = arith.constant 0 : i32
    return %c0_i32, %c0_i32_0 : i32, i32
  }
  func.func @transform_6(%arg0: i32, %arg1: i32) -> (i32, i32) {
    %c0_i32 = arith.constant 0 : i32
    %c0_i32_0 = arith.constant 0 : i32
    %c0_i32_1 = arith.constant 0 : i32
    return %c0_i32, %c0_i32_0 : i32, i32
  }
  func.func @transform_7(%arg0: i32, %arg1: i32) -> (i32, i32) {
    %c0_i32 = arith.constant 0 : i32
    %c0_i32_0 = arith.constant 0 : i32
    %c0_i32_1 = arith.constant 0 : i32
    return %c0_i32, %c0_i32_0 : i32, i32
  }
  func.func @transform_8(%arg0: i32, %arg1: i32) -> (i32, i32, i32) {
    %c0_i32 = arith.constant 0 : i32
    %c0_i32_0 = arith.constant 0 : i32
    %c0_i32_1 = arith.constant 0 : i32
    return %arg0, %c0_i32, %c0_i32_0 : i32, i32, i32
  }
}

</mosaic_0001>

<bundles_post_ra>
// kernel: tpu_custom_call.1
= control target key start
LH: loop header
LB: loop body
LE: loop exit
PB: predicated region body
PF: predicated region fallthrough
CT: control target
= control target key end

     0   :  { %s3943_s27 = smov 0   ;;  %s3945_s28 = smov 0   ;;  %s5088_s0 = inlined_call_operand.vmem [shape: f32[4,32,512], index: 0, kind: input, shape index: {}]   ;;  %s5089_s1 = inlined_call_operand.vmem [shape: bf16[125,32], index: 1, kind: input, shape index: {}]   ;;  %s5090_s2 = inlined_call_operand.vmem [shape: f32[125,1], index: 2, kind: input, shape index: {}]   ;;  %s5091_s3 = inlined_call_operand.vmem [shape: f32[125,1], index: 3, kind: input, shape index: {}]   ;;  %s5092_s4 = inlined_call_operand.vmem [shape: f32[2,32], index: 4, kind: input, shape index: {}]   ;;  %s5093_s5 = inlined_call_operand.vmem [shape: f32[2,1], index: 5, kind: input, shape index: {}]   ;;  %s5094_s6 = inlined_call_operand.vmem [shape: f32[125,2], index: 6, kind: input, shape index: {}]   ;;  %s5095_s7 = inlined_call_operand.vmem [shape: f32[125,1], index: 7, kind: input, shape index: {}]   ;;  %s5096_s8 = inlined_call_operand.vmem [shape: f32[4,125,2], index: 8, kind: output, shape index: {}]  }
   0x1   :  { %s3947_s29 = smov 0  }
   0x2 LB: > { %s30_s30 = sadd.s32 1, %s3884_s28  ;;  %p2915_p0 = scmp.ge.s32.totalorder %s3888_s29, 1  ;;  %s3888_s29 = sphi %s3947_s29, %s18_s29   ;;  %s3884_s28 = sphi %s3945_s28, %s5158_s28   ;;  %s3880_s27 = sphi %s3943_s27, %s5157_s27  }
   0x3   : > { %p32_p1 = scmp.ge.s32.totalorder %s30_s30, 4  ;;  %p281_p2 = scmp.lt.s32.totalorder %s3888_s29, 5 }
   0x5   : > { %s5160_s30 = smov (%p32_p1, %s30_s30), 0  ;;  %p282_p3 = pnand %p2915_p0, %p281_p2 }
   0x7   : > { %285 = sbr.rel (%p282_p3) target bundleno = 1850 (0x73a), region = 52 }
   0xe   : > { %p320_p4 = scmp.lt.s32.totalorder %s3880_s27, 3  ;;  %v3890_v0 = vmov 1065369472   ;;  %vm340_vm0 = vcmask 7168   ;;  %v3891_v53 = vmov 0.0   ;;  %v3892_v54 = vmov -inf  }
   0xf   : > { %3089 = vmatprep.subr.bf16.mxu0 %v3890_v0  ;;  %3117 = vmatprep.subr.bf16.mxu1 %v3890_v0  ;;  %341 = vst.msk [vmem:[#allocation2] sm:$0xff] %vm340_vm0, %v3891_v53  ;;  %342 = vst.msk [vmem:[#allocation2 + $0x8] sm:$0xff] %vm340_vm0, %v3891_v53  ;;  %v3893_v55 = vmov 0   ;;  %vm345_vm1 = vcmask 261120   ;;  %vm3895_vm2 = vmmov 0   ;;  %vm1563_vm4 = vcmask 15360  }
  0x10   : > { %3090 = vmatpush3.bf16.msra.mxu0 %v3890_v0  ;;  %3118 = vmatpush3.bf16.msra.mxu1 %v3890_v0  ;;  %s5162_s27 = smov (!%p320_p4, %s3880_s27), 3  ;;  %343 = vst.msk [vmem:[#allocation2 + $0x10] sm:$0xff] %vm340_vm0, %v3891_v53  ;;  %344 = vst.msk [vmem:[#allocation2 + $0x18] sm:$0xff] %vm340_vm0, %v3891_v53  ;;  %vm1612_vm5 = vcmask 1041408   ;;  %s3896_s14 = smov 127   ;;  %vm2388_vm7 = vcmask 1044480  }
  0x11   : > { %3091 = vmatprep.subr.bf16.mxu0 %v3890_v0  ;;  %3119 = vmatprep.subr.bf16.mxu1 %v3890_v0  ;;  %s3053_s9 = sshll.u32 %s5162_s27, 7  ;;  %350 = vst.msk [vmem:[#allocation4] sm:$0xff] %vm340_vm0, %v3892_v54  ;;  %351 = vst.msk [vmem:[#allocation4 + $0x8] sm:$0xff] %vm340_vm0, %v3892_v54  ;;  %vm3897_vm8 = vmmov 1   ;;  %vm2242_vm10 = vcmask 1022976   ;;  %vm2288_vm11 = vcmask 1019904  }
  0x12   : > { %s3975_s12 = scalar_lea.vmem %s5088_s0, %s3053_s9  ;;  %352 = vst.msk [vmem:[#allocation4 + $0x10] sm:$0xff] %vm340_vm0, %v3892_v54  ;;  %353 = vst.msk [vmem:[#allocation4 + $0x18] sm:$0xff] %vm340_vm0, %v3892_v54  ;;  %3626 = vset.pattern.permute.xlu1 %v3893_v55  ;;  %3620 = vset.pattern.permute.xlu0 %v3893_v55  ;;  %vm1137_vm12 = vcmask 258048   ;;  %s5014_s13 = scalar_lea.vmem %s5096_s8, %s3053_s9  ;;  %vm2840_vm13 = vcmask 12288  }
  0x13   : > { %v355_v1 = vld [vmem:[%s3975_s12 + $0x8] sm:$0xff]  ;;  %v357_v3 = vld [vmem:[%s3975_s12 + $0x18] sm:$0xff]  ;;  %v354_v6 = vld [vmem:[%s3975_s12] sm:$0xff]  ;;  %346 = vst.msk [vmem:[#allocation3] sm:$0xff] %vm345_vm1, %v3891_v53 }
  0x14   : > { %3092 = vmatpush3.bf16.msra.mxu0 %v3890_v0  ;;  %3120 = vmatpush3.bf16.msra.mxu1 %v3890_v0  ;;  %v359_v2 = vld [vmem:[%s3975_s12 + $0x28] sm:$0xff]  ;;  %v361_v5 = vld [vmem:[%s3975_s12 + $0x38] sm:$0xff]  ;;  %v358_v7 = vld [vmem:[%s3975_s12 + $0x20] sm:$0xff]  ;;  %347 = vst.msk [vmem:[#allocation3 + $0x8] sm:$0xff] %vm345_vm1, %v3891_v53 }
  0x15   : > { %3093 = vmatprep.subr.bf16.mxu0 %v3890_v0  ;;  %3121 = vmatprep.subr.bf16.mxu1 %v3890_v0  ;;  %v3984_v4 = vpack.c.bf16 %v359_v2, %v355_v1  ;;  %v3989_v8 = vpack.c.bf16 %v361_v5, %v357_v3  ;;  %v3991_v9 = vpack.c.bf16 %v358_v7, %v354_v6  ;;  %v356_v10 = vld [vmem:[%s3975_s12 + $0x10] sm:$0xff]  ;;  %v363_v12 = vld [vmem:[%s3975_s12 + $0x48] sm:$0xff]  ;;  %v365_v15 = vld [vmem:[%s3975_s12 + $0x58] sm:$0xff] }
  0x16   : > { %v360_v11 = vld [vmem:[%s3975_s12 + $0x30] sm:$0xff]  ;;  %v367_v14 = vld [vmem:[%s3975_s12 + $0x68] sm:$0xff]  ;;  %v369_v16 = vld [vmem:[%s3975_s12 + $0x78] sm:$0xff]  ;;  %348 = vst.msk [vmem:[#allocation3 + $0x10] sm:$0xff] %vm345_vm1, %v3891_v53 }
  0x17   : > { %414 = vmatprep.mubr.bf16.mxu0 %v3984_v4  ;;  %v3997_v13 = vpack.c.bf16 %v360_v11, %v356_v10  ;;  %v616_v17 = vunpack.c.l.bf16 %v3984_v4  ;;  %v620_v18 = vunpack.c.h.bf16 %v3984_v4  ;;  %v4006_v19 = vpack.c.bf16 %v367_v14, %v363_v12  ;;  %v362_v20 = vld [vmem:[%s3975_s12 + $0x40] sm:$0xff]  ;;  %v364_v22 = vld [vmem:[%s3975_s12 + $0x50] sm:$0xff]  ;;  %463 = vmatprep.mubr.bf16.mxu1 %v3989_v8  ;;  %349 = vst.msk [vmem:[#allocation3 + $0x18] sm:$0xff] %vm345_vm1, %v3891_v53  ;;  %vm4491_vm6 = vmpackc.low %vm340_vm0, %vm340_vm0 }
  0x18   : > { %3094 = vmatpush3.bf16.msra.mxu0 %v3890_v0  ;;  %3122 = vmatpush3.bf16.msra.mxu1 %v3890_v0  ;;  %v366_v21 = vld [vmem:[%s3975_s12 + $0x60] sm:$0xff]  ;;  %v615_v23 = vunpack.c.l.bf16 %v3991_v9  ;;  %v368_v25 = vld [vmem:[%s3975_s12 + $0x70] sm:$0xff]  ;;  %v618_v27 = vunpack.c.l.bf16 %v3989_v8  ;;  %v619_v28 = vunpack.c.h.bf16 %v3991_v9  ;;  %v377_v33 = vpack.c.bf16 %v369_v16, %v365_v15  ;;  %v648_v61 = vld [vmem:[#allocation4 + $0x8] sm:$0xff] }
  0x19   : > { %3095 = vmatprep.subr.bf16.mxu0 %v3890_v0  ;;  %3123 = vmatprep.subr.bf16.mxu1 %v3890_v0  ;;  %v4014_v24 = vpack.c.bf16 %v366_v21, %v362_v20  ;;  %v617_v26 = vunpack.c.l.bf16 %v3997_v13  ;;  %v4021_v29 = vpack.c.bf16 %v368_v25, %v364_v22  ;;  %v621_v31 = vunpack.c.h.bf16 %v3997_v13  ;;  %v647_v56 = vld [vmem:[#allocation4] sm:$0xff]  ;;  %v649_v57 = vld [vmem:[#allocation4 + $0x10] sm:$0xff]  ;;  %v650_v63 = vld [vmem:[#allocation4 + $0x18] sm:$0xff] }
  0x1a   : > { %v651_v30 = vmax.f32 %v615_v23, %v616_v17  ;;  %v624_v32 = vunpack.c.l.bf16 %v4006_v19  ;;  %v656_v34 = vmax.f32 %v619_v28, %v620_v18  ;;  %v628_v39 = vunpack.c.h.bf16 %v4006_v19  ;;  %v4087_v7 = vld [vmem:[%s5089_s1] sm:$0xff]   ;;  %v379_v23 = vld [vmem:[#allocation2 + $0x8] sm:$0xff]  ;;  %vm3583_vm9 = vmpackc.low %vm2388_vm7, %vm3897_vm8 }
  0x1b   : > { %v623_v35 = vunpack.c.l.bf16 %v4014_v24  ;;  %v627_v36 = vunpack.c.h.bf16 %v4014_v24  ;;  %v625_v38 = vunpack.c.l.bf16 %v4021_v29  ;;  %v629_v40 = vunpack.c.h.bf16 %v4021_v29  ;;  %v378_v17 = vld [vmem:[#allocation2] sm:$0xff] }
  0x1c   : > { %3096 = vmatpush3.bf16.msra.mxu0 %v3890_v0  ;;  %3124 = vmatpush3.bf16.msra.mxu1 %v3890_v0  ;;  %v652_v37 = vmax.f32 %v651_v30, %v617_v26  ;;  %v626_v41 = vunpack.c.l.bf16 %v377_v33  ;;  %v622_v44 = vunpack.c.h.bf16 %v3989_v8  ;;  %v657_v45 = vmax.f32 %v656_v34, %v621_v31 }
  0x1d   : > { %3097 = vmatprep.subr.bf16.mxu0 %v3890_v0  ;;  %3125 = vmatprep.subr.bf16.mxu1 %v3890_v0  ;;  %v661_v42 = vmax.f32 %v623_v35, %v624_v32  ;;  %v666_v46 = vmax.f32 %v627_v36, %v628_v39  ;;  %v630_v48 = vunpack.c.h.bf16 %v377_v33  ;;  %v380_v35 = vld [vmem:[#allocation2 + $0x10] sm:$0xff] }
  0x1e   : > { %v653_v43 = vmax.f32 %v652_v37, %v618_v27  ;;  %v658_v51 = vmax.f32 %v657_v45, %v622_v44 }
  0x1f   : > { %v662_v47 = vmax.f32 %v661_v42, %v625_v38  ;;  %v667_v49 = vmax.f32 %v666_v46, %v629_v40 }
  0x20   : > { %3098 = vmatpush3.bf16.msra.mxu0 %v3890_v0  ;;  %3126 = vmatpush3.bf16.msra.mxu1 %v3890_v0 }
  0x21   : > { %3099 = vmatprep.subr.bf16.mxu0 %v3890_v0  ;;  %3127 = vmatprep.subr.bf16.mxu1 %v3890_v0  ;;  %v663_v50 = vmax.f32 %v662_v47, %v626_v41  ;;  %v668_v52 = vmax.f32 %v667_v49, %v630_v48  ;;  %v381_v41 = vld [vmem:[#allocation2 + $0x18] sm:$0xff] }
  0x22   : > { %654 = vmax.xlane.f32.xlu0 %v653_v43 }
  0x23   : > { %664 = vmax.xlane.f32.xlu1 %v663_v50 }
  0x24   : > { %3100 = vmatpush3.bf16.msra.mxu0 %v3890_v0  ;;  %3128 = vmatpush3.bf16.msra.mxu1 %v3890_v0 }
  0x25   : > { %3101 = vmatprep.subr.bf16.mxu0 %v3890_v0  ;;  %3129 = vmatprep.subr.bf16.mxu1 %v3890_v0 }
  0x26   : > { %659 = vmax.xlane.f32.xlu0 %v658_v51 }
  0x27   : > { %669 = vmax.xlane.f32.xlu1 %v668_v52  ;;  %v489_v52 = vld [vmem:[#allocation3] sm:$0xff] }
  0x28   : > { %3102 = vmatpush3.bf16.msra.mxu0 %v3890_v0  ;;  %3130 = vmatpush3.bf16.msra.mxu1 %v3890_v0 }
  0x29   : > { %3103 = vmatprep.subr.bf16.mxu0 %v3890_v0  ;;  %3131 = vmatprep.subr.bf16.mxu1 %v3890_v0 }
  0x2c   : > { %3104 = vmatpush3.bf16.msra.mxu0 %v3890_v0  ;;  %3132 = vmatpush3.bf16.msra.mxu1 %v3890_v0 }
  0x2d   : > { %493 = vmatprep.subr.bf16.mxu0 %v3984_v4  ;;  %542 = vmatprep.subr.bf16.mxu1 %v3989_v8 }
  0x2f   : > { %415 = vmatmul.mubr.bf16.vlgmr.msra.gmra.mrb[0].mxu0 %v3991_v9  ;;  %464 = vmatmul.mubr.bf16.vlgmr.msra.gmra.mrb[0].mxu1 %v3997_v13 }
  0x30   : > { %422 = vmatprep.mubr.bf16.mxu0 %v4006_v19  ;;  %471 = vmatprep.mubr.bf16.mxu1 %v377_v33 }
  0x35   : > { %494 = vmatpush1.bf16.xpose.msra.mxu0 %v3991_v9  ;;  %543 = vmatpush1.bf16.xpose.msra.mxu1 %v3997_v13 }
  0x36   : > { %495 = vmatprep.subr.bf16.mxu0 %v4006_v19  ;;  %544 = vmatprep.subr.bf16.mxu1 %v377_v33 }
  0x37   : > { %423 = vmatmul.mubr.bf16.gmra.mrb[4].mxu0 %v4014_v24  ;;  %472 = vmatmul.mubr.bf16.gmra.mrb[4].mxu1 %v4021_v29 }
  0x38   : > { %525 = vmatprep.mubr.bf16.mxu0 %v3984_v4  ;;  %574 = vmatprep.mubr.bf16.mxu1 %v3989_v8  ;;  %v4098_v8 = vunpack.c.l.bf16 %v4087_v7 }
  0x3d   : > { %496 = vmatpush1.bf16.xpose.msra.mxu0 %v4014_v24  ;;  %545 = vmatpush1.bf16.xpose.msra.mxu1 %v4021_v29 }
  0x44   : > { %526 = vmatmul.mubr.bf16.vlgmr.msra.gmra.mrb[8].mxu0 %v3991_v9  ;;  %575 = vmatmul.mubr.bf16.vlgmr.msra.gmra.mrb[8].mxu1 %v3997_v13 }
  0x45   : > { %533 = vmatprep.mubr.bf16.mxu0 %v4006_v19  ;;  %582 = vmatprep.mubr.bf16.mxu1 %v377_v33 }
  0x4c   : > { %534 = vmatmul.mubr.bf16.gmra.mrb[12].mxu0 %v4014_v24  ;;  %583 = vmatmul.mubr.bf16.gmra.mrb[12].mxu1 %v4021_v29 }
  0x4d   : > { %3311 = vmatprep.mubr.msk.f32.mxu1 %vm345_vm1, %v4098_v8  ;;  %3279 = vmatprep.mubr.msk.f32.mxu0 %vm345_vm1, %v4098_v8 }
  0xaf   : > { %v655_v58 = vpop.xlane.xlu0 %654 }
  0xb0   : > { %v671_v59 = vmax.f32 %v647_v56, %v655_v58  ;;  %v665_v60 = vpop.xlane.xlu1 %664  ;;  %v1471_v58 = vld [vmem:[%s5095_s7 + $0x20] sm:$0xff] }
  0xb1   : > { %v673_v62 = vmax.f32 %v649_v57, %v665_v60 }
  0xb2   : > { %675 = vst.msk [vmem:[#allocation4] sm:$0xff] %vm340_vm0, %v671_v59 }
  0xb3   : > { %v660_v0 = vpop.xlane.xlu0 %659  ;;  %677 = vst.msk [vmem:[#allocation4 + $0x10] sm:$0xff] %vm340_vm0, %v673_v62 }
  0xb4   : > { %v672_v1 = vmax.f32 %v648_v61, %v660_v0  ;;  %v670_v2 = vpop.xlane.xlu1 %669  ;;  %v490_v61 = vld [vmem:[#allocation3 + $0x8] sm:$0xff] }
  0xb5   : > { %v674_v3 = vmax.f32 %v650_v63, %v670_v2 }
  0xb6   : > { %676 = vst.msk [vmem:[#allocation4 + $0x8] sm:$0xff] %vm340_vm0, %v672_v1 }
  0xb7   : > { %678 = vst.msk [vmem:[#allocation4 + $0x18] sm:$0xff] %vm340_vm0, %v674_v3 }
  0xb9   : > { %v1322_v4 = vld [vmem:[#allocation4] sm:$0xff] }
  0xbd   : > { %v1323_v5 = vld [vmem:[#allocation4 + $0x8] sm:$0xff] }
  0xbe   : > { %v3627_v6 = vpack.i.bf16 %v1323_v5, %v1322_v4 }
  0xc0   : > { %3628 = vperm.xlu1 %3626, %v3627_v6  }
 0x102   : > { %v3105_v9 = vpop.f32.mrb[0].mxu0  ;;  %v3133_v10 = vpop.f32.mrb[0].mxu1 }
 0x103   : > { %v3134_v11 = vpop.f32.mrb[1].mxu1  ;;  %v3106_v12 = vpop.f32.mrb[1].mxu0 }
 0x104   : > { %v3135_v13 = vadd.f32 %v3134_v11, %v3133_v10  ;;  %v3107_v14 = vadd.f32 %v3106_v12, %v3105_v9  ;;  %v3108_v15 = vpop.f32.mrb[2].mxu0  ;;  %v3136_v16 = vpop.f32.mrb[2].mxu1  ;;  %v1473_v10 = vld [vmem:[%s5095_s7 + $0x30] sm:$0xff]  ;;  %v3083_v12 = vld [vmem:[%s5089_s1 + $0x8] sm:$0xff]  }
 0x105   : > { %v3109_v18 = vpop.f32.mrb[3].mxu0  ;;  %v3137_v19 = vpop.f32.mrb[3].mxu1 }
 0x106   : > { %v466_v20 = vadd.f32 %v3135_v13, %v3107_v14  ;;  %v3110_v21 = vadd.f32 %v3109_v18, %v3108_v15  ;;  %v3138_v22 = vadd.f32 %v3137_v19, %v3136_v16  ;;  %v1324_v13 = vld [vmem:[#allocation4 + $0x10] sm:$0xff]  ;;  %v1325_v14 = vld [vmem:[#allocation4 + $0x18] sm:$0xff] }
 0x107   : > { %v491_v16 = vld [vmem:[#allocation3 + $0x10] sm:$0xff] }
 0x108   : > { %v480_v24 = vadd.f32 %v466_v20, %v378_v17  ;;  %v469_v25 = vadd.f32 %v3138_v22, %v3110_v21  ;;  %v4120_v21 = vunpack.c.h.bf16 %v4087_v7  ;;  %v1475_v22 = vld [vmem:[%s5095_s7 + $0x40] sm:$0xff] }
 0x10a   : > { %485 = vst.msk [vmem:[#allocation2] sm:$0xff] %vm340_vm0, %v480_v24  ;;  %v481_v26 = vadd.f32 %v469_v25, %v379_v23  ;;  %v3111_v27 = vpop.f32.mrb[4].mxu0  ;;  %v3139_v28 = vpop.f32.mrb[4].mxu1  ;;  %v492_v24 = vld [vmem:[#allocation3 + $0x18] sm:$0xff] }
 0x10b   : > { %v3112_v29 = vpop.f32.mrb[5].mxu0  ;;  %v3140_v30 = vpop.f32.mrb[5].mxu1 }
 0x10c   : > { %486 = vst.msk [vmem:[#allocation2 + $0x8] sm:$0xff] %vm340_vm0, %v481_v26  ;;  %v3113_v31 = vadd.f32 %v3112_v29, %v3111_v27  ;;  %v3141_v32 = vadd.f32 %v3140_v30, %v3139_v28  ;;  %v3114_v33 = vpop.f32.mrb[6].mxu0  ;;  %v3142_v34 = vpop.f32.mrb[6].mxu1  ;;  %v4125_v26 = vunpack.c.l.bf16 %v3083_v12  ;;  %v3637_v27 = vpack.i.bf16 %v1325_v14, %v1324_v13 }
 0x10d   : > { %v3115_v36 = vpop.f32.mrb[7].mxu0  ;;  %v3143_v37 = vpop.f32.mrb[7].mxu1 }
 0x10e   : > { %v474_v38 = vadd.f32 %v3141_v32, %v3113_v31  ;;  %v3116_v39 = vadd.f32 %v3115_v36, %v3114_v33  ;;  %v3144_v40 = vadd.f32 %v3143_v37, %v3142_v34  ;;  %v3084_v32 = vld [vmem:[%s5089_s1 + $0x10] sm:$0xff]   ;;  %v4135_v34 = vunpack.c.h.bf16 %v3083_v12 }
 0x10f   : > { %v1477_v36 = vld [vmem:[%s5095_s7 + $0x50] sm:$0xff]  ;;  %v600_v12 = vlaneseq }
 0x110   : > { %v482_v42 = vadd.f32 %v474_v38, %v380_v35  ;;  %v477_v43 = vadd.f32 %v3144_v40, %v3116_v39  ;;  %v1371_v35 = vld [vmem:[%s5093_s5] sm:$0x3]  ;;  %v4143_v38 = vunpack.c.l.bf16 %v3084_v32  ;;  %v3085_v40 = vld [vmem:[%s5089_s1 + $0x18] sm:$0xff]  }
 0x111   : > { %v714_v44 = vld [vmem:[#allocation2] sm:$0xff]  ;;  %v4279_v14 = vand.u32 127, %v600_v12  ;;  %v1457_v12 = vld [vmem:[%s5094_s6 + $0x30] sm:$0xff] }
 0x112   : > { %487 = vst.msk [vmem:[#allocation2 + $0x10] sm:$0xff] %vm340_vm0, %v482_v42  ;;  %v483_v45 = vadd.f32 %v477_v43, %v381_v41  ;;  %v1317_v48 = vmul.f32 0.001953125, %v714_v44  ;;  %v4153_v41 = vunpack.c.h.bf16 %v3084_v32  ;;  %v1467_v42 = vld [vmem:[%s5095_s7] sm:$0xff] }
 0x113   : > { %v715_v46 = vld [vmem:[#allocation2 + $0x8] sm:$0xff]  ;;  %v1479_v43 = vld [vmem:[%s5095_s7 + $0x60] sm:$0xff]  ;;  %5107 = vst [vmem:[#allocation9_spill] sm:$0xff] %v4279_v14  ;;  %vm1321_vm3 = vcmp.eq.s32.totalorder %v4279_v14, 0 }
 0x114   : > { %488 = vst.msk [vmem:[#allocation2 + $0x18] sm:$0xff] %vm340_vm0, %v483_v45  ;;  %v3484_v47 = vpack.c.bf16 %v715_v46, %v714_v44  ;;  %v1318_v49 = vmul.f32 0.001953125, %v715_v46  ;;  %v4161_v44 = vunpack.c.l.bf16 %v3085_v40  ;;  %v3086_v45 = vld [vmem:[%s5089_s1 + $0x20] sm:$0xff]  }
 0x116   : > { %3485 = vmatprep.subr.bf16.mxu0 %v3484_v47  ;;  %v3621_v50 = vpack.i.bf16 %v1318_v49, %v1317_v48  ;;  %v1468_v48 = vld [vmem:[%s5095_s7 + $0x8] sm:$0xff]  ;;  %v1481_v49 = vld [vmem:[%s5095_s7 + $0x70] sm:$0xff] }
 0x117   : > { %3487 = vmatpush3.bf16.msra.mxu0 %v3484_v47  ;;  %v527_v51 = vpop.f32.mrb[8].mxu0  ;;  %v576_v54 = vpop.f32.mrb[8].mxu1  ;;  %v4170_v47 = vunpack.c.h.bf16 %v3085_v40 }
 0x118   : > { %3622 = vperm.xlu0 %3620, %v3621_v50   ;;  %v577_v55 = vadd.f32 %v576_v54, %v527_v51  ;;  %v529_v56 = vpop.f32.mrb[9].mxu0  ;;  %v578_v57 = vpop.f32.mrb[9].mxu1  ;;  %v4178_v51 = vunpack.c.l.bf16 %v3086_v45  ;;  %v3087_v54 = vld [vmem:[%s5089_s1 + $0x28] sm:$0xff]  }
 0x119   : > { %v716_v59 = vld [vmem:[#allocation2 + $0x10] sm:$0xff]  ;;  %v530_v60 = vpop.f32.mrb[10].mxu0  ;;  %v579_v62 = vpop.f32.mrb[10].mxu1  ;;  %v4192_v57 = vunpack.c.l.bf16 %v3087_v54 }
 0x11a   : > { %v591_v63 = vadd.f32 %v577_v55, %v489_v52  ;;  %v580_v0 = vadd.f32 %v579_v62, %v530_v60  ;;  %v532_v1 = vpop.f32.mrb[11].mxu0  ;;  %v581_v2 = vpop.f32.mrb[11].mxu1  ;;  %v1319_v5 = vmul.f32 0.001953125, %v716_v59  ;;  %v4187_v55 = vunpack.c.h.bf16 %v3086_v45  ;;  %v1469_v56 = vld [vmem:[%s5095_s7 + $0x10] sm:$0xff] }
 0x11b   : > { %v717_v3 = vld [vmem:[#allocation2 + $0x18] sm:$0xff]  ;;  %v4201_v60 = vunpack.c.h.bf16 %v3087_v54  ;;  %v1472_v1 = vld [vmem:[%s5095_s7 + $0x28] sm:$0xff] }
 0x11c   : > { %1505 = vperm.xlu0 %3620, %v1471_v58   ;;  %v3488_v4 = vpack.c.bf16 %v717_v3, %v716_v59  ;;  %v1320_v6 = vmul.f32 0.001953125, %v717_v3  ;;  %596 = vst.msk [vmem:[#allocation3] sm:$0xff] %vm345_vm1, %v591_v63  ;;  %v592_v9 = vadd.f32 %v580_v0, %v490_v61  ;;  %v3088_v58 = vld [vmem:[%s5089_s1 + $0x30] sm:$0xff]   ;;  %v3894_v59 = vmov 0.0|0.0   ;;  %v1470_v61 = vld [vmem:[%s5095_s7 + $0x18] sm:$0xff] }
 0x11d   : > { %v4208_v62 = vunpack.c.l.bf16 %v3088_v58  ;;  %v696_v63 = vld [vmem:[%s5089_s1 + $0x38] sm:$0xf]  ;;  %v4219_v0 = vunpack.c.h.bf16 %v3088_v58  ;;  %v697_v3 = vld [vmem:[%s5089_s1 + $0x3c] sm:$0x7] }
 0x11e   : > { %3489 = vmatprep.subr.bf16.mxu0 %v3488_v4  ;;  %v3632_v11 = vpack.i.bf16 %v1320_v6, %v1319_v5  ;;  %597 = vst.msk [vmem:[#allocation3 + $0x8] sm:$0xff] %vm345_vm1, %v592_v9  ;;  %v4226_v2 = vunpack.c.l.bf16 %v696_v63  ;;  %v1474_v5 = vld [vmem:[%s5095_s7 + $0x38] sm:$0xff]  ;;  %v1476_v6 = vld [vmem:[%s5095_s7 + $0x48] sm:$0xff] }
 0x11f   : > { %3491 = vmatpush3.bf16.msra.mxu0 %v3488_v4  ;;  %v535_v15 = vpop.f32.mrb[12].mxu0  ;;  %v584_v17 = vpop.f32.mrb[12].mxu1  ;;  %5103 = vst [vmem:[#allocation5_spill] sm:$0xff] %v4208_v62  ;;  %5104 = vst [vmem:[#allocation6_spill] sm:$0xff] %v4219_v0  ;;  %v4237_v4 = vunpack.c.l.bf16 %v697_v3  ;;  %v1478_v9 = vld [vmem:[%s5095_s7 + $0x58] sm:$0xff] }
 0x120   : > { %3633 = vperm.xlu1 %3626, %v3632_v11   ;;  %1515 = vperm.xlu0 %3620, %v1473_v10   ;;  %v585_v18 = vadd.f32 %v584_v17, %v535_v15  ;;  %v537_v19 = vpop.f32.mrb[13].mxu0  ;;  %v586_v20 = vpop.f32.mrb[13].mxu1  ;;  %5105 = vst [vmem:[#allocation7_spill] sm:$0xff] %v4226_v2  ;;  %v1480_v10 = vld [vmem:[%s5095_s7 + $0x68] sm:$0xff]  ;;  %v1482_v11 = vld [vmem:[%s5095_s7 + $0x78] sm:$0x1f] }
 0x121   : > { %v538_v23 = vpop.f32.mrb[14].mxu0  ;;  %v587_v25 = vpop.f32.mrb[14].mxu1  ;;  %5106 = vst [vmem:[#allocation8_spill] sm:$0xff] %v4237_v4 }
 0x122   : > { %v593_v28 = vadd.f32 %v585_v18, %v491_v16  ;;  %v588_v29 = vadd.f32 %v587_v25, %v538_v23  ;;  %v540_v30 = vpop.f32.mrb[15].mxu0  ;;  %v589_v31 = vpop.f32.mrb[15].mxu1  ;;  %3280 = vmatmul.mubr.msk.f32.vlgmr.msra.gmra.mrb[16].mxu0 %vm345_vm1, %v4120_v21 }
 0x123   : > { %v927_v7 = vld [vmem:[#allocation3] sm:$0xff]  ;;  %3282 = vmatprep.mubr.msk.f32.mxu0 %vm345_vm1, %v4125_v26 }
 0x124   : > { %3638 = vperm.xlu1 %3626, %v3637_v27   ;;  %1525 = vperm.xlu0 %3620, %v1475_v22   ;;  %598 = vst.msk [vmem:[#allocation3 + $0x10] sm:$0xff] %vm345_vm1, %v593_v28  ;;  %v594_v33 = vadd.f32 %v588_v29, %v492_v24 }
 0x125   : > { %v928_v37 = vld [vmem:[#allocation3 + $0x8] sm:$0xff] }
 0x126   : > { %599 = vst.msk [vmem:[#allocation3 + $0x18] sm:$0xff] %vm345_vm1, %v594_v33  ;;  %v3492_v39 = vpack.c.bf16 %v928_v37, %v927_v7  ;;  %3283 = vmatmul.mubr.msk.f32.gmra.mrb[18].mxu0 %vm345_vm1, %v4135_v34  ;;  %v1370_v7 = vld [vmem:[%s5092_s4] sm:$0x3] }
 0x127   : > { %3285 = vmatprep.mubr.msk.f32.mxu0 %vm345_vm1, %v4143_v38  ;;  %v1451_v33 = vld [vmem:[%s5094_s6] sm:$0xff] }
 0x128   : > { %1374 = vperm.xlu1 %3626, %v1371_v35   ;;  %1535 = vperm.xlu0 %3620, %v1477_v36  }
 0x129   : > { %3493 = vmatprep.subr.bf16.mxu1 %v3492_v39 }
 0x12a   : > { %3495 = vmatpush3.bf16.msra.mxu1 %v3492_v39  ;;  %3286 = vmatmul.mubr.msk.f32.gmra.mrb[20].mxu0 %vm345_vm1, %v4153_v41 }
 0x12b   : > { %v929_v46 = vld [vmem:[#allocation3 + $0x10] sm:$0xff]  ;;  %3288 = vmatprep.mubr.msk.f32.mxu0 %vm345_vm1, %v4161_v44 }
 0x12c   : > { %1485 = vperm.xlu1 %3626, %v1467_v42   ;;  %1545 = vperm.xlu0 %3620, %v1479_v43  }
 0x12d   : > { %v930_v50 = vld [vmem:[#allocation3 + $0x18] sm:$0xff] }
 0x12e   : > { %v3496_v52 = vpack.c.bf16 %v930_v50, %v929_v46  ;;  %3289 = vmatmul.mubr.msk.f32.gmra.mrb[22].mxu0 %vm345_vm1, %v4170_v47 }
 0x12f   : > { %3291 = vmatprep.mubr.msk.f32.mxu0 %vm345_vm1, %v4178_v51 }
 0x130   : > { %1490 = vperm.xlu1 %3626, %v1468_v48   ;;  %1555 = vperm.xlu0 %3620, %v1481_v49  }
 0x131   : > { %3497 = vmatprep.subr.bf16.mxu1 %v3496_v52 }
 0x132   : > { %3499 = vmatpush3.bf16.msra.mxu1 %v3496_v52  ;;  %3292 = vmatmul.mubr.msk.f32.gmra.mrb[24].mxu0 %vm345_vm1, %v4187_v55 }
 0x133   : > { %3500 = vmatprep.subr.bf16.mxu1 %v3894_v59  ;;  %3294 = vmatprep.mubr.msk.f32.mxu0 %vm345_vm1, %v4192_v57 }
 0x134   : > { %1495 = vperm.xlu1 %3626, %v1469_v56  }
 0x135   : > { %3312 = vmatmul.mubr.msk.f32.vlgmr.msra.gmra.mrb[16].mxu1 %vm345_vm1, %v4120_v21 }
 0x136   : > { %3314 = vmatprep.mubr.msk.f32.mxu1 %vm345_vm1, %v4125_v26  ;;  %3295 = vmatmul.mubr.msk.f32.gmra.mrb[26].mxu0 %vm345_vm1, %v4201_v60 }
 0x137   : > { %3297 = vmatprep.mubr.msk.f32.mxu0 %vm345_vm1, %v4208_v62 }
 0x138   : > { %1500 = vperm.xlu1 %3626, %v1470_v61  }
 0x139   : > { %3315 = vmatmul.mubr.msk.f32.gmra.mrb[18].mxu1 %vm345_vm1, %v4135_v34 }
 0x13a   : > { %3317 = vmatprep.mubr.msk.f32.mxu1 %vm345_vm1, %v4143_v38  ;;  %3298 = vmatmul.mubr.msk.f32.gmra.mrb[28].mxu0 %vm345_vm1, %v4219_v0 }
 0x13b   : > { %3300 = vmatprep.mubr.msk.f32.mxu0 %vm345_vm1, %v4226_v2 }
 0x13c   : > { %1510 = vperm.xlu1 %3626, %v1472_v1  }
 0x13d   : > { %3318 = vmatmul.mubr.msk.f32.gmra.mrb[20].mxu1 %vm345_vm1, %v4153_v41 }
 0x13e   : > { %3320 = vmatprep.mubr.msk.f32.mxu1 %vm345_vm1, %v4161_v44  ;;  %3301 = vmatmul.mubr.msk.f32.gmra.mrb[30].mxu0 %vm345_vm1, %v4237_v4 }
 0x13f   : > { %v3629_v13 = vpop.permute.xlu1 %3628 }
 0x140   : > { %1520 = vperm.xlu1 %3626, %v1474_v5   ;;  %v3631_v15 = vunpack.i.h.bf16 %v3629_v13  ;;  %v3630_v16 = vunpack.i.l.bf16 %v3629_v13  ;;  %v1452_v5 = vld [vmem:[%s5094_s6 + $0x8] sm:$0xff]  ;;  %v1458_v13 = vld [vmem:[%s5094_s6 + $0x38] sm:$0xff] }
 0x141   : > { %3321 = vmatmul.mubr.msk.f32.gmra.mrb[22].mxu1 %vm345_vm1, %v4170_v47 }
 0x142   : > { %3323 = vmatprep.mubr.msk.f32.mxu1 %vm345_vm1, %v4178_v51 }
 0x144   : > { %1530 = vperm.xlu1 %3626, %v1476_v6   ;;  %v1453_v6 = vld [vmem:[%s5094_s6 + $0x10] sm:$0xff] }
 0x145   : > { %3324 = vmatmul.mubr.msk.f32.gmra.mrb[24].mxu1 %vm345_vm1, %v4187_v55 }
 0x146   : > { %3326 = vmatprep.mubr.msk.f32.mxu1 %vm345_vm1, %v4192_v57 }
 0x148   : > { %1540 = vperm.xlu1 %3626, %v1478_v9   ;;  %v1454_v9 = vld [vmem:[%s5094_s6 + $0x18] sm:$0xff] }
 0x149   : > { %3327 = vmatmul.mubr.msk.f32.gmra.mrb[26].mxu1 %vm345_vm1, %v4201_v60 }
 0x14a   : > { %3329 = vmatprep.mubr.msk.f32.mxu1 %vm345_vm1, %v4208_v62 }
 0x14c   : > { %1550 = vperm.xlu1 %3626, %v1480_v10   ;;  %v1455_v10 = vld [vmem:[%s5094_s6 + $0x20] sm:$0xff] }
 0x14d   : > { %3330 = vmatmul.mubr.msk.f32.gmra.mrb[28].mxu1 %vm345_vm1, %v4219_v0 }
 0x14e   : > { %3332 = vmatprep.mubr.msk.f32.mxu1 %vm345_vm1, %v4226_v2 }
 0x150   : > { %1560 = vperm.xlu1 %3626, %v1482_v11   ;;  %v1456_v11 = vld [vmem:[%s5094_s6 + $0x28] sm:$0xff] }
 0x151   : > { %3333 = vmatmul.mubr.msk.f32.gmra.mrb[30].mxu1 %vm345_vm1, %v4237_v4 }
 0x152   : > { %3343 = vmatprep.mubr.msk.f32.mxu1 %vm3895_vm2, %v3891_v53 }
 0x197   : > { %v3623_v17 = vpop.permute.xlu0 %3622 }
 0x198   : > { %v3625_v18 = vunpack.i.h.bf16 %v3623_v17  ;;  %v3624_v19 = vunpack.i.l.bf16 %v3623_v17  ;;  %v1461_v17 = vld [vmem:[%s5094_s6 + $0x50] sm:$0xff] }
 0x19a   : > { %v1367_v20 = vsel %vm1321_vm3, %v3625_v18, %v3631_v15  ;;  %v1366_v22 = vsel %vm1321_vm3, %v3624_v19, %v3630_v16  ;;  %v1459_v15 = vld [vmem:[%s5094_s6 + $0x40] sm:$0xff]  ;;  %v1460_v16 = vld [vmem:[%s5094_s6 + $0x48] sm:$0xff]  ;;  %v1462_v18 = vld [vmem:[%s5094_s6 + $0x58] sm:$0xff] }
 0x19b   : > { %v3501_v23 = vpack.c.bf16 %v1367_v20, %v1366_v22  ;;  %v1463_v19 = vld [vmem:[%s5094_s6 + $0x60] sm:$0xff]  ;;  %v1464_v20 = vld [vmem:[%s5094_s6 + $0x68] sm:$0xff]  ;;  %v1465_v22 = vld [vmem:[%s5094_s6 + $0x70] sm:$0xff] }
 0x19d   : > { %3502 = vmatpush3.bf16.msra.mxu1 %v3501_v23  ;;  %v1466_v23 = vld [vmem:[%s5094_s6 + $0x78] sm:$0x1f] }
 0x19e   : > { %3503 = vmatprep.subr.bf16.mxu1 %v3894_v59 }
 0x19f   : > { %v3634_v53 = vpop.permute.xlu1 %3633 }
 0x1a0   : > { %v3636_v25 = vunpack.i.h.bf16 %v3634_v53  ;;  %v3635_v27 = vunpack.i.l.bf16 %v3634_v53 }
 0x1a3   : > { %v3639_v24 = vpop.permute.xlu1 %3638 }
 0x1a4   : > { %v3641_v28 = vunpack.i.h.bf16 %v3639_v24  ;;  %v3640_v29 = vunpack.i.l.bf16 %v3639_v24 }
 0x1a6   : > { %v1368_v30 = vsel %vm1321_vm3, %v3635_v27, %v3640_v29  ;;  %v1369_v31 = vsel %vm1321_vm3, %v3636_v25, %v3641_v28  ;;  %v1506_v29 = vpop.permute.xlu0 %1505 }
 0x1a7   : > { %v3504_v32 = vpack.c.bf16 %v1369_v31, %v1368_v30  ;;  %v1375_v59 = vpop.permute.xlu1 %1374 }
 0x1a9   : > { %3505 = vmatpush3.bf16.msra.mxu1 %v3504_v32 }
 0x1ab   : > { %v1486_v53 = vpop.permute.xlu1 %1485 }
 0x1ac   : > { %3344 = vmatmul.mubr.msk.f32.vlgmr.msra.gmra.mrb[32].mxu1 %vm345_vm1, %v1370_v7 }
 0x1ad   : > { %3348 = vmatprep.mubr.msk.f32.mxu1 %vm1563_vm4, %v1451_v33 }
 0x1af   : > { %v1491_v24 = vpop.permute.xlu1 %1490 }
 0x1b3   : > { %v1496_v25 = vpop.permute.xlu1 %1495 }
 0x1b7   : > { %v1501_v27 = vpop.permute.xlu1 %1500 }
 0x1bb   : > { %v1511_v28 = vpop.permute.xlu1 %1510 }
 0x208   : > { %v4298_v35 = vpop.f32.mrb[16].mxu1 }
 0x209   : > { %v4300_v36 = vpop.f32.mrb[17].mxu1 }
 0x20c   : > { %v4302_v37 = vpop.f32.mrb[18].mxu1 }
 0x20d   : > { %v4304_v39 = vpop.f32.mrb[19].mxu1 }
 0x210   : > { %v4306_v40 = vpop.f32.mrb[20].mxu1 }
 0x211   : > { %v4308_v42 = vpop.f32.mrb[21].mxu1 }
 0x214   : > { %v4310_v43 = vpop.f32.mrb[22].mxu1 }
 0x215   : > { %v4312_v45 = vpop.f32.mrb[23].mxu1 }
 0x218   : > { %v4314_v46 = vpop.f32.mrb[24].mxu1 }
 0x219   : > { %v4316_v48 = vpop.f32.mrb[25].mxu1 }
 0x21c   : > { %v4318_v49 = vpop.f32.mrb[26].mxu1 }
 0x21d   : > { %5108 = vst [vmem:[#allocation10_spill] sm:$0xff] %v4318_v49  ;;  %v4320_v50 = vpop.f32.mrb[27].mxu1 }
 0x220   : > { %v4322_v52 = vpop.f32.mrb[28].mxu1 }
 0x221   : > { %5109 = vst [vmem:[#allocation11_spill] sm:$0xff] %v4322_v52  ;;  %v4324_v54 = vpop.f32.mrb[29].mxu1 }
 0x222   : > { %5110 = vst [vmem:[#allocation12_spill] sm:$0xff] %v4324_v54 }
 0x224   : > { %v4326_v56 = vpop.f32.mrb[30].mxu1 }
 0x225   : > { %5111 = vst [vmem:[#allocation13_spill] sm:$0xff] %v4326_v56  ;;  %v4328_v58 = vpop.f32.mrb[31].mxu1 }
 0x226   : > { %5112 = vst [vmem:[#allocation14_spill] sm:$0xff] %v4328_v58 }
 0x27f   : > { %v1446_v61 = vpop.f32.mrb[32].mxu1 }
 0x280   : > { %v1447_v63 = vadd.f32 %v1446_v61, %v1375_v59  ;;  %v3345_v1 = vpop.f32.mrb[33].mxu1  ;;  %v1521_v59 = vpop.permute.xlu1 %1520 }
 0x281   : > { %v1516_v1 = vpop.permute.xlu0 %1515 }
 0x282   : > { %v1450_v3 = vmax.f32 %v1447_v63, 0.0 }
 0x284   : > { %3346 = vmatprep.subr.msk.mxu1 %vm1612_vm5, %v1450_v3 }
 0x285   : > { %3347 = vmatpush3.msk.msra.mxu1 %vm1612_vm5, %v1450_v3 }
 0x286   : > { %3349 = vmatmul.mubr.msk.f32.vlgmr.msra.gmra.mrb[34].mxu1 %vm1563_vm4, %v1452_v5 }
 0x287   : > { %3351 = vmatprep.mubr.msk.f32.mxu1 %vm1563_vm4, %v1453_v6 }
 0x28a   : > { %3352 = vmatmul.mubr.msk.f32.gmra.mrb[36].mxu1 %vm1563_vm4, %v1454_v9 }
 0x28b   : > { %3354 = vmatprep.mubr.msk.f32.mxu1 %vm1563_vm4, %v1455_v10 }
 0x28e   : > { %3355 = vmatmul.mubr.msk.f32.gmra.mrb[38].mxu1 %vm1563_vm4, %v1456_v11 }
 0x28f   : > { %3357 = vmatprep.mubr.msk.f32.mxu1 %vm1563_vm4, %v1457_v12 }
 0x292   : > { %3358 = vmatmul.mubr.msk.f32.gmra.mrb[40].mxu1 %vm1563_vm4, %v1458_v13 }
 0x293   : > { %3360 = vmatprep.mubr.msk.f32.mxu1 %vm1563_vm4, %v1459_v15  ;;  %v1531_v15 = vpop.permute.xlu1 %1530 }
 0x296   : > { %3361 = vmatmul.mubr.msk.f32.gmra.mrb[42].mxu1 %vm1563_vm4, %v1460_v16 }
 0x297   : > { %3363 = vmatprep.mubr.msk.f32.mxu1 %vm1563_vm4, %v1461_v17  ;;  %v1526_v17 = vpop.permute.xlu0 %1525 }
 0x29a   : > { %3364 = vmatmul.mubr.msk.f32.gmra.mrb[44].mxu1 %vm1563_vm4, %v1462_v18 }
 0x29b   : > { %3366 = vmatprep.mubr.msk.f32.mxu1 %vm1563_vm4, %v1463_v19 }
 0x29e   : > { %3367 = vmatmul.mubr.msk.f32.gmra.mrb[46].mxu1 %vm1563_vm4, %v1464_v20 }
 0x29f   : > { %3369 = vmatprep.mubr.msk.f32.mxu1 %vm1563_vm4, %v1465_v22 }
 0x2a2   : > { %3370 = vmatmul.mubr.msk.f32.gmra.mrb[48].mxu1 %vm1563_vm4, %v1466_v23 }
 0x359   : > { %v3350_v30 = vpop.f32.mrb[34].mxu1 }
 0x35a   : > { %v1688_v31 = vadd.f32 %v3350_v30, %v1491_v24  ;;  %v1682_v32 = vpop.f32.mrb[35].mxu1  ;;  %v1541_v30 = vpop.permute.xlu1 %1540 }
 0x35b   : > { %v1683_v7 = vadd.f32 %v1682_v32, %v1486_v53 }
 0x35c   : > { %v2971_v33 = vmul.f32 -1.442695, %v1688_v31 }
 0x35d   : > { %v2970_v61 = vmul.f32 -1.442695, %v1683_v7  ;;  %v3353_v63 = vpop.f32.mrb[36].mxu1  ;;  %v1536_v7 = vpop.permute.xlu0 %1535 }
 0x35e   : > { %3642 = vpow2.f32 %v2971_v33  ;;  %v1698_v3 = vadd.f32 %v3353_v63, %v1501_v27  ;;  %v1692_v5 = vpop.f32.mrb[37].mxu1 }
 0x35f   : > { %3644 = vpow2.f32 %v2970_v61  ;;  %v1693_v6 = vadd.f32 %v1692_v5, %v1496_v25 }
 0x360   : > { %v2973_v9 = vmul.f32 -1.442695, %v1698_v3 }
 0x361   : > { %v2972_v10 = vmul.f32 -1.442695, %v1693_v6  ;;  %v3356_v11 = vpop.f32.mrb[38].mxu1 }
 0x362   : > { %3646 = vpow2.f32 %v2973_v9  ;;  %v1708_v12 = vadd.f32 %v3356_v11, %v1511_v28  ;;  %v1702_v13 = vpop.f32.mrb[39].mxu1 }
 0x363   : > { %3648 = vpow2.f32 %v2972_v10  ;;  %v1703_v16 = vadd.f32 %v1702_v13, %v1506_v29  ;;  %v1551_v13 = vpop.permute.xlu1 %1550 }
 0x364   : > { %v2975_v18 = vmul.f32 -1.442695, %v1708_v12 }
 0x365   : > { %v2974_v19 = vmul.f32 -1.442695, %v1703_v16  ;;  %v3359_v20 = vpop.f32.mrb[40].mxu1 }
 0x366   : > { %3650 = vpow2.f32 %v2975_v18  ;;  %v1718_v22 = vadd.f32 %v3359_v20, %v1521_v59  ;;  %v1712_v23 = vpop.f32.mrb[41].mxu1 }
 0x367   : > { %3652 = vpow2.f32 %v2974_v19  ;;  %v1713_v53 = vadd.f32 %v1712_v23, %v1516_v1 }
 0x368   : > { %v3643_v24 = vpop.eup %3642  ;;  %v2977_v25 = vmul.f32 -1.442695, %v1718_v22 }
 0x369   : > { %v3645_v27 = vpop.eup %3644  ;;  %v1810_v31 = vadd.f32 1.0, %v3643_v24  ;;  %v2976_v32 = vmul.f32 -1.442695, %v1713_v53  ;;  %v3362_v28 = vpop.f32.mrb[42].mxu1 }
 0x36a   : > { %v1809_v33 = vadd.f32 1.0, %v3645_v27  ;;  %3654 = vpow2.f32 %v2977_v25  ;;  %v1728_v29 = vadd.f32 %v3362_v28, %v1531_v15  ;;  %v1722_v61 = vpop.f32.mrb[43].mxu1  ;;  %v1546_v15 = vpop.permute.xlu0 %1545 }
 0x36b   : > { %3656 = vrcp.f32 %v1810_v31  ;;  %v1723_v63 = vadd.f32 %v1722_v61, %v1526_v17  ;;  %v1561_v28 = vpop.permute.xlu1 %1560 }
 0x36c   : > { %v3647_v3 = vpop.eup %3646  ;;  %3658 = vrcp.f32 %v1809_v33  ;;  %v2979_v59 = vmul.f32 -1.442695, %v1728_v29 }
 0x36d   : > { %v3649_v5 = vpop.eup %3648  ;;  %v1812_v6 = vadd.f32 1.0, %v3647_v3  ;;  %3660 = vpow2.f32 %v2976_v32  ;;  %v2978_v1 = vmul.f32 -1.442695, %v1723_v63  ;;  %v3365_v9 = vpop.f32.mrb[44].mxu1 }
 0x36e   : > { %v1811_v10 = vadd.f32 1.0, %v3649_v5  ;;  %3662 = vpow2.f32 %v2979_v59  ;;  %v1738_v11 = vadd.f32 %v3365_v9, %v1541_v30  ;;  %v1732_v12 = vpop.f32.mrb[45].mxu1  ;;  %v1556_v63 = vpop.permute.xlu0 %1555 }
 0x36f   : > { %3664 = vrcp.f32 %v1812_v6  ;;  %v1733_v16 = vadd.f32 %v1732_v12, %v1536_v7 }
 0x370   : > { %v3651_v18 = vpop.eup %3650  ;;  %3666 = vrcp.f32 %v1811_v10  ;;  %v2981_v19 = vmul.f32 -1.442695, %v1738_v11 }
 0x371   : > { %v3653_v17 = vpop.eup %3652  ;;  %v1814_v20 = vadd.f32 1.0, %v3651_v18  ;;  %3668 = vpow2.f32 %v2978_v1  ;;  %v2980_v22 = vmul.f32 -1.442695, %v1733_v16  ;;  %v3368_v23 = vpop.f32.mrb[46].mxu1 }
 0x372   : > { %v1813_v53 = vadd.f32 1.0, %v3653_v17  ;;  %3670 = vpow2.f32 %v2981_v19  ;;  %v1748_v24 = vadd.f32 %v3368_v23, %v1551_v13  ;;  %v1742_v25 = vpop.f32.mrb[47].mxu1 }
 0x373   : > { %3672 = vrcp.f32 %v1814_v20  ;;  %v1743_v27 = vadd.f32 %v1742_v25, %v1546_v15 }
 0x374   : > { %v3655_v30 = vpop.eup %3654  ;;  %3674 = vrcp.f32 %v1813_v53  ;;  %v2983_v31 = vmul.f32 -1.442695, %v1748_v24 }
 0x375   : > { %v4390_v32 = vpop.eup %3656  ;;  %v1816_v7 = vadd.f32 1.0, %v3655_v30  ;;  %3676 = vpow2.f32 %v2980_v22  ;;  %v2982_v33 = vmul.f32 -1.442695, %v1743_v27  ;;  %v3371_v29 = vpop.f32.mrb[48].mxu1 }
 0x376   : > { %v4392_v61 = vpop.eup %3658  ;;  %3678 = vpow2.f32 %v2983_v31  ;;  %v1758_v3 = vadd.f32 %v3371_v29, %v1561_v28  ;;  %1875 = vrot.lane.b32.xlu1 %v4390_v32, %s3896_s14  ;;  %v1752_v59 = vpop.f32.mrb[49].mxu1 }
 0x377   : > { %v3661_v5 = vpop.eup %3660  ;;  %3680 = vrcp.f32 %v1816_v7  ;;  %v1753_v6 = vadd.f32 %v1752_v59, %v1556_v63  ;;  %1873 = vrot.lane.b32.xlu0 %v4392_v61, %s3896_s14  ;;  %3404 = vmatprep.mubr.msk.f32.mxu0 %vm340_vm0, %v4392_v61 }
 0x378   : > { %v3663_v1 = vpop.eup %3662  ;;  %v1815_v9 = vadd.f32 1.0, %v3661_v5  ;;  %3682 = vpow2.f32 %v2982_v33  ;;  %v2985_v10 = vmul.f32 -1.442695, %v1758_v3 }
 0x379   : > { %v4400_v11 = vpop.eup %3664  ;;  %v1818_v12 = vadd.f32 1.0, %v3663_v1  ;;  %v2984_v13 = vmul.f32 -1.442695, %v1753_v6 }
 0x37a   : > { %v4402_v16 = vpop.eup %3666  ;;  %3684 = vrcp.f32 %v1815_v9  ;;  %1879 = vrot.lane.b32.xlu1 %v4400_v11, %s3896_s14 }
 0x37b   : > { %v3669_v18 = vpop.eup %3668  ;;  %3686 = vrcp.f32 %v1818_v12  ;;  %1877 = vrot.lane.b32.xlu0 %v4402_v16, %s3896_s14 }
 0x37c   : > { %v3671_v15 = vpop.eup %3670  ;;  %v1817_v19 = vadd.f32 1.0, %v3669_v18  ;;  %3688 = vpow2.f32 %v2985_v10 }
 0x37d   : > { %v4408_v17 = vpop.eup %3672  ;;  %v1820_v20 = vadd.f32 1.0, %v3671_v15  ;;  %3690 = vpow2.f32 %v2984_v13  ;;  %v4456_v13 = vpop.f32.mrb[16].mxu0 }
 0x37e   : > { %v4410_v22 = vpop.eup %3674  ;;  %3692 = vrcp.f32 %v1817_v19  ;;  %1883 = vrot.lane.b32.xlu1 %v4408_v17, %s3896_s14  ;;  %5113 = vst [vmem:[#allocation15_spill] sm:$0xff] %v4456_v13  ;;  %v4458_v18 = vpop.f32.mrb[17].mxu0 }
 0x37f   : > { %v3677_v23 = vpop.eup %3676  ;;  %3694 = vrcp.f32 %v1820_v20  ;;  %1881 = vrot.lane.b32.xlu0 %v4410_v22, %s3896_s14  ;;  %5114 = vst [vmem:[#allocation16_spill] sm:$0xff] %v4458_v18  ;;  %v4460_v15 = vpop.f32.mrb[18].mxu0 }
 0x380   : > { %v3679_v53 = vpop.eup %3678  ;;  %v1819_v24 = vadd.f32 1.0, %v3677_v23  ;;  %5115 = vst [vmem:[#allocation17_spill] sm:$0xff] %v4460_v15  ;;  %v4462_v19 = vpop.f32.mrb[19].mxu0 }
 0x381   : > { %v4416_v25 = vpop.eup %3680  ;;  %v1822_v27 = vadd.f32 1.0, %v3679_v53  ;;  %5116 = vst [vmem:[#allocation18_spill] sm:$0xff] %v4462_v19  ;;  %v4464_v20 = vpop.f32.mrb[20].mxu0 }
 0x382   : > { %v3683_v30 = vpop.eup %3682  ;;  %3696 = vrcp.f32 %v1819_v24  ;;  %1887 = vrot.lane.b32.xlu1 %v4416_v25, %s3896_s14  ;;  %5117 = vst [vmem:[#allocation19_spill] sm:$0xff] %v4464_v20  ;;  %v4466_v23 = vpop.f32.mrb[21].mxu0 }
 0x383   : > { %3698 = vrcp.f32 %v1822_v27  ;;  %v1821_v31 = vadd.f32 1.0, %v3683_v30  ;;  %5118 = vst [vmem:[#allocation20_spill] sm:$0xff] %v4466_v23  ;;  %v4468_v53 = vpop.f32.mrb[22].mxu0 }
 0x384   : > { %v4420_v28 = vpop.eup %3684  ;;  %5119 = vst [vmem:[#allocation21_spill] sm:$0xff] %v4468_v53  ;;  %v4470_v24 = vpop.f32.mrb[23].mxu0 }
 0x385   : > { %v4422_v7 = vpop.eup %3686  ;;  %3700 = vrcp.f32 %v1821_v31  ;;  %1885 = vrot.lane.b32.xlu0 %v4420_v28, %s3896_s14  ;;  %5120 = vst [vmem:[#allocation22_spill] sm:$0xff] %v4470_v24  ;;  %v4472_v27 = vpop.f32.mrb[24].mxu0 }
 0x386   : > { %v3689_v33 = vpop.eup %3688  ;;  %1891 = vrot.lane.b32.xlu1 %v4422_v7, %s3896_s14  ;;  %5121 = vst [vmem:[#allocation23_spill] sm:$0xff] %v4472_v27  ;;  %v4474_v30 = vpop.f32.mrb[25].mxu0 }
 0x387   : > { %v3691_v29 = vpop.eup %3690  ;;  %v1824_v63 = vadd.f32 1.0, %v3689_v33  ;;  %5122 = vst [vmem:[#allocation24_spill] sm:$0xff] %v4474_v30  ;;  %v4476_v31 = vpop.f32.mrb[26].mxu0 }
 0x388   : > { %v4428_v3 = vpop.eup %3692  ;;  %v1823_v59 = vadd.f32 1.0, %v3691_v29  ;;  %5123 = vst [vmem:[#allocation25_spill] sm:$0xff] %v4476_v31  ;;  %v4478_v33 = vpop.f32.mrb[27].mxu0 }
 0x389   : > { %v4430_v5 = vpop.eup %3694  ;;  %3702 = vrcp.f32 %v1824_v63  ;;  %1889 = vrot.lane.b32.xlu0 %v4428_v3, %s3896_s14  ;;  %5124 = vst [vmem:[#allocation26_spill] sm:$0xff] %v4478_v33  ;;  %v4480_v29 = vpop.f32.mrb[28].mxu0 }
 0x38a   : > { %3704 = vrcp.f32 %v1823_v59  ;;  %1895 = vrot.lane.b32.xlu1 %v4430_v5, %s3896_s14  ;;  %5125 = vst [vmem:[#allocation27_spill] sm:$0xff] %v4480_v29  ;;  %v4482_v63 = vpop.f32.mrb[29].mxu0 }
 0x38b   : > { %5126 = vst [vmem:[#allocation28_spill] sm:$0xff] %v4482_v63  ;;  %v4484_v59 = vpop.f32.mrb[30].mxu0 }
 0x38c   : > { %v4436_v6 = vpop.eup %3696  ;;  %5127 = vst [vmem:[#allocation29_spill] sm:$0xff] %v4484_v59  ;;  %v4486_v14 = vpop.f32.mrb[31].mxu0 }
 0x38d   : > { %v4438_v1 = vpop.eup %3698  ;;  %1893 = vrot.lane.b32.xlu0 %v4436_v6, %s3896_s14  ;;  %5128 = vst [vmem:[#allocation30_spill] sm:$0xff] %v4486_v14 }
 0x38e   : > { %1899 = vrot.lane.b32.xlu1 %v4438_v1, %s3896_s14 }
 0x38f   : > { %v4444_v9 = vpop.eup %3700 }
 0x391   : > { %1897 = vrot.lane.b32.xlu0 %v4444_v9, %s3896_s14 }
 0x393   : > { %v4448_v10 = vpop.eup %3702 }
 0x394   : > { %v4450_v12 = vpop.eup %3704  ;;  %1903 = vrot.lane.b32.xlu1 %v4448_v10, %s3896_s14 }
 0x395   : > { %1901 = vrot.lane.b32.xlu0 %v4450_v12, %s3896_s14 }
 0x3e8   : > { %v1876_v20 = vpop.permute.xlu1 %1875 }
 0x3e9   : > { %v1922_v53 = vadd.f32 %v4390_v32, %v1876_v20  ;;  %v1874_v24 = vpop.permute.xlu0 %1873 }
 0x3ea   : > { %v1921_v31 = vadd.f32 %v4392_v61, %v1874_v24  ;;  %v3506_v33 = vpack.c.bf16 %v1876_v20, %v1874_v24 }
 0x3eb   : > { %v2987_v29 = vmul.f32 -1.442695, %v1922_v53 }
 0x3ec   : > { %v2986_v30 = vmul.f32 -1.442695, %v1921_v31  ;;  %v1880_v63 = vpop.permute.xlu1 %1879  ;;  %3508 = vmatprep.subr.msk.bf16.mxu0 %vm4491_vm6, %v3506_v33 }
 0x3ed   : > { %3706 = vpow2.f32 %v2987_v29  ;;  %v1924_v14 = vadd.f32 %v4400_v11, %v1880_v63  ;;  %v1878_v59 = vpop.permute.xlu0 %1877  ;;  %3511 = vmatpush3.bf16.xpose.msk.msra.mxu0 %vm4491_vm6, %v3506_v33 }
 0x3ee   : > { %3708 = vpow2.f32 %v2986_v30  ;;  %v1923_v23 = vadd.f32 %v4402_v16, %v1878_v59  ;;  %v3512_v19 = vpack.c.bf16 %v1880_v63, %v1878_v59 }
 0x3ef   : > { %v2989_v15 = vmul.f32 -1.442695, %v1924_v14 }
 0x3f0   : > { %v2988_v61 = vmul.f32 -1.442695, %v1923_v23  ;;  %v1884_v20 = vpop.permute.xlu1 %1883  ;;  %3514 = vmatprep.subr.msk.bf16.mxu0 %vm4491_vm6, %v3512_v19 }
 0x3f1   : > { %3710 = vpow2.f32 %v2989_v15  ;;  %v1926_v53 = vadd.f32 %v4408_v17, %v1884_v20  ;;  %v1882_v24 = vpop.permute.xlu0 %1881 }
 0x3f2   : > { %3712 = vpow2.f32 %v2988_v61  ;;  %v1925_v31 = vadd.f32 %v4410_v22, %v1882_v24  ;;  %v3518_v33 = vpack.c.bf16 %v1884_v20, %v1882_v24 }
 0x3f3   : > { %v2991_v29 = vmul.f32 -1.442695, %v1926_v53 }
 0x3f4   : > { %v2990_v13 = vmul.f32 -1.442695, %v1925_v31  ;;  %v1888_v30 = vpop.permute.xlu1 %1887 }
 0x3f5   : > { %3714 = vpow2.f32 %v2991_v29  ;;  %v1928_v63 = vadd.f32 %v4416_v25, %v1888_v30  ;;  %3517 = vmatpush3.bf16.xpose.msk.msra.mxu0 %vm4491_vm6, %v3512_v19 }
 0x3f6   : > { %3716 = vpow2.f32 %v2990_v13  ;;  %3520 = vmatprep.subr.msk.bf16.mxu0 %vm4491_vm6, %v3518_v33 }
 0x3f7   : > { %v3707_v14 = vpop.eup %3706  ;;  %v2993_v15 = vmul.f32 -1.442695, %v1928_v63  ;;  %v1886_v23 = vpop.permute.xlu0 %1885 }
 0x3f8   : > { %v3709_v59 = vpop.eup %3708  ;;  %v1986_v61 = vadd.f32 1.0, %v3707_v14  ;;  %v1927_v53 = vadd.f32 %v4420_v28, %v1886_v23  ;;  %v1892_v31 = vpop.permute.xlu1 %1891  ;;  %v3524_v63 = vpack.c.bf16 %v1888_v30, %v1886_v23 }
 0x3f9   : > { %v1985_v20 = vadd.f32 1.0, %v3709_v59  ;;  %3718 = vpow2.f32 %v2993_v15  ;;  %v1930_v24 = vadd.f32 %v4422_v7, %v1892_v31 }
 0x3fa   : > { %3720 = vrcp.f32 %v1986_v61  ;;  %v2992_v29 = vmul.f32 -1.442695, %v1927_v53 }
 0x3fb   : > { %v3711_v18 = vpop.eup %3710  ;;  %3722 = vrcp.f32 %v1985_v20  ;;  %v2995_v13 = vmul.f32 -1.442695, %v1930_v24  ;;  %v1890_v19 = vpop.permute.xlu0 %1889 }
 0x3fc   : > { %v3713_v56 = vpop.eup %3712  ;;  %v1988_v4 = vadd.f32 1.0, %v3711_v18  ;;  %3724 = vpow2.f32 %v2992_v29  ;;  %v1929_v58 = vadd.f32 %v4428_v3, %v1890_v19  ;;  %v1896_v14 = vpop.permute.xlu1 %1895  ;;  %v3530_v52 = vpack.c.bf16 %v1892_v31, %v1890_v19 }
 0x3fd   : > { %v1987_v2 = vadd.f32 1.0, %v3713_v56  ;;  %3726 = vpow2.f32 %v2995_v13  ;;  %v1932_v59 = vadd.f32 %v4430_v5, %v1896_v14  ;;  %3523 = vmatpush3.bf16.xpose.msk.msra.mxu0 %vm4491_vm6, %v3518_v33 }
 0x3fe   : > { %3728 = vrcp.f32 %v1988_v4  ;;  %v2994_v15 = vmul.f32 -1.442695, %v1929_v58  ;;  %3526 = vmatprep.subr.msk.bf16.mxu0 %vm4491_vm6, %v3524_v63 }
 0x3ff   : > { %v3715_v61 = vpop.eup %3714  ;;  %3730 = vrcp.f32 %v1987_v2  ;;  %v2997_v18 = vmul.f32 -1.442695, %v1932_v59  ;;  %v1894_v53 = vpop.permute.xlu0 %1893 }
 0x400   : > { %v3717_v30 = vpop.eup %3716  ;;  %v1990_v23 = vadd.f32 1.0, %v3715_v61  ;;  %3732 = vpow2.f32 %v2994_v15  ;;  %v1931_v56 = vadd.f32 %v4436_v6, %v1894_v53  ;;  %v4520_v20 = vpop.permute.xlu1 %1899  ;;  %v3536_v49 = vpack.c.bf16 %v1896_v14, %v1894_v53 }
 0x401   : > { %v1989_v24 = vadd.f32 1.0, %v3717_v30  ;;  %3734 = vpow2.f32 %v2997_v18  ;;  %v1934_v4 = vadd.f32 %v4438_v1, %v4520_v20 }
 0x402   : > { %3736 = vrcp.f32 %v1990_v23  ;;  %v2996_v58 = vmul.f32 -1.442695, %v1931_v56 }
 0x403   : > { %v3719_v33 = vpop.eup %3718  ;;  %3738 = vrcp.f32 %v1989_v24  ;;  %v2999_v29 = vmul.f32 -1.442695, %v1934_v4  ;;  %v1898_v2 = vpop.permute.xlu0 %1897 }
 0x404   : > { %v3721_v13 = vpop.eup %3720  ;;  %v1992_v59 = vadd.f32 1.0, %v3719_v33  ;;  %3740 = vpow2.f32 %v2996_v58  ;;  %v1933_v15 = vadd.f32 %v4444_v9, %v1898_v2 }
 0x405   : > { %v3723_v61 = vpop.eup %3722  ;;  %3742 = vpow2.f32 %v2999_v29  ;;  %3529 = vmatpush3.bf16.xpose.msk.msra.mxu0 %vm4491_vm6, %v3524_v63 }
 0x406   : > { %v3725_v18 = vpop.eup %3724  ;;  %v2998_v30 = vmul.f32 -1.442695, %v1933_v15  ;;  %v4527_v0 = vpop.permute.xlu1 %1903  ;;  %3532 = vmatprep.subr.msk.bf16.mxu0 %vm4491_vm6, %v3530_v52  ;;  %v3554_v23 = vpack.c.bf16 %v3721_v13, %v3723_v61  ;;  %3744 = vrcp.f32 %v1992_v59 }
 0x407   : > { %v3727_v56 = vpop.eup %3726  ;;  %v1991_v24 = vadd.f32 1.0, %v3725_v18  ;;  %v1936_v31 = vadd.f32 %v4448_v10, %v4527_v0  ;;  %v1902_v19 = vpop.permute.xlu0 %1901 }
 0x408   : > { %v3729_v4 = vpop.eup %3728  ;;  %v1994_v58 = vadd.f32 1.0, %v3727_v56  ;;  %3746 = vpow2.f32 %v2998_v30  ;;  %v1935_v63 = vadd.f32 %v4450_v12, %v1902_v19  ;;  %3555 = vmatprep.subr.bf16.mxu1 %v3554_v23 }
 0x409   : > { %v3731_v33 = vpop.eup %3730  ;;  %3748 = vrcp.f32 %v1991_v24  ;;  %v3001_v29 = vmul.f32 -1.442695, %v1936_v31  ;;  %3557 = vmatpush3.bf16.msra.mxu1 %v3554_v23 }
 0x40a   : > { %v3733_v15 = vpop.eup %3732  ;;  %3750 = vrcp.f32 %v1994_v58  ;;  %v3000_v13 = vmul.f32 -1.442695, %v1935_v63  ;;  %v3558_v61 = vpack.c.bf16 %v3729_v4, %v3731_v33 }
 0x40b   : > { %v3735_v59 = vpop.eup %3734  ;;  %v1993_v18 = vadd.f32 1.0, %v3733_v15  ;;  %3752 = vpow2.f32 %v3001_v29 }
 0x40c   : > { %v3737_v62 = vpop.eup %3736  ;;  %v1996_v54 = vadd.f32 1.0, %v3735_v59  ;;  %3754 = vpow2.f32 %v3000_v13  ;;  %3559 = vmatprep.subr.bf16.mxu1 %v3558_v61 }
 0x40d   : > { %v3739_v30 = vpop.eup %3738  ;;  %3756 = vrcp.f32 %v1993_v18  ;;  %3535 = vmatpush3.bf16.xpose.msk.msra.mxu0 %vm4491_vm6, %v3530_v52  ;;  %3561 = vmatpush3.bf16.msra.mxu1 %v3558_v61  ;;  %v3542_v52 = vpack.c.bf16 %v4520_v20, %v1898_v2  ;;  %v3548_v2 = vpack.c.bf16 %v4527_v0, %v1902_v19 }
 0x40e   : > { %v3741_v56 = vpop.eup %3740  ;;  %3538 = vmatprep.subr.msk.bf16.mxu0 %vm4491_vm6, %v3536_v49  ;;  %v3562_v23 = vpack.c.bf16 %v3737_v62, %v3739_v30  ;;  %3758 = vrcp.f32 %v1996_v54 }
 0x40f   : > { %v3743_v24 = vpop.eup %3742  ;;  %v1995_v31 = vadd.f32 1.0, %v3741_v56 }
 0x410   : > { %v1998_v4 = vadd.f32 1.0, %v3743_v24  ;;  %3563 = vmatprep.subr.bf16.mxu1 %v3562_v23  ;;  %v3745_v58 = vpop.eup %3744 }
 0x411   : > { %3760 = vrcp.f32 %v1995_v31  ;;  %3565 = vmatpush3.bf16.msra.mxu1 %v3562_v23 }
 0x412   : > { %v3747_v14 = vpop.eup %3746  ;;  %3762 = vrcp.f32 %v1998_v4 }
 0x413   : > { %v3749_v53 = vpop.eup %3748  ;;  %v1997_v63 = vadd.f32 1.0, %v3747_v14 }
 0x414   : > { %v3751_v33 = vpop.eup %3750  ;;  %v3566_v29 = vpack.c.bf16 %v3745_v58, %v3749_v53 }
 0x415   : > { %v3753_v15 = vpop.eup %3752  ;;  %3764 = vrcp.f32 %v1997_v63  ;;  %3541 = vmatpush3.bf16.xpose.msk.msra.mxu0 %vm4491_vm6, %v3536_v49 }
 0x416   : > { %v3755_v62 = vpop.eup %3754  ;;  %v2000_v54 = vadd.f32 1.0, %v3753_v15  ;;  %3567 = vmatprep.subr.bf16.mxu1 %v3566_v29  ;;  %3544 = vmatprep.subr.msk.bf16.mxu0 %vm4491_vm6, %v3542_v52 }
 0x417   : > { %v3757_v13 = vpop.eup %3756  ;;  %v1999_v61 = vadd.f32 1.0, %v3755_v62  ;;  %3569 = vmatpush3.bf16.msra.mxu1 %v3566_v29 }
 0x418   : > { %3766 = vrcp.f32 %v2000_v54  ;;  %v3570_v59 = vpack.c.bf16 %v3751_v33, %v3757_v13  ;;  %v3759_v18 = vpop.eup %3758 }
 0x419   : > { %3768 = vrcp.f32 %v1999_v61  ;;  %v1076_v61 = vmul.f32 %v4098_v8, %v4300_v36  ;;  %v1079_v36 = vmul.f32 %v4302_v37, %v4135_v34  ;;  %v1083_v34 = vmul.f32 %v4310_v43, %v4170_v47  ;;  %v5131_v47 = vld [vmem:[#allocation10_spill] sm:$0xff]  ;;  %v5132_v43 = vld [vmem:[#allocation12_spill] sm:$0xff] }
 0x41a   : > { %3571 = vmatprep.subr.bf16.mxu1 %v3570_v59 }
 0x41b   : > { %v3761_v20 = vpop.eup %3760  ;;  %3573 = vmatpush3.bf16.msra.mxu1 %v3570_v59  ;;  %v1092_v8 = vsel %vm345_vm1, %v1076_v61, 0.0 }
 0x41c   : > { %v3574_v30 = vpack.c.bf16 %v3759_v18, %v3761_v20  ;;  %v3763_v49 = vpop.eup %3762  ;;  %v1077_v20 = vmul.f32 %v4298_v35, %v4120_v21  ;;  %v1082_v35 = vmul.f32 %v4161_v44, %v4312_v45  ;;  %v1086_v44 = vmul.f32 %v4192_v57, %v4320_v50  ;;  %v5135_v57 = vld [vmem:[#allocation11_spill] sm:$0xff] }
 0x41d   : > { %3547 = vmatpush3.bf16.xpose.msk.msra.mxu0 %vm4491_vm6, %v3542_v52  ;;  %v5136_v50 = vld [vmem:[#allocation7_spill] sm:$0xff] }
 0x41e   : > { %3575 = vmatprep.subr.bf16.mxu1 %v3574_v30  ;;  %3550 = vmatprep.subr.msk.bf16.mxu0 %vm4491_vm6, %v3548_v2 }
 0x41f   : > { %v3765_v56 = vpop.eup %3764  ;;  %3577 = vmatpush3.bf16.msra.mxu1 %v3574_v30 }
 0x420   : > { %v3578_v23 = vpack.c.bf16 %v3763_v49, %v3765_v56  ;;  %v1080_v49 = vmul.f32 %v4143_v38, %v4308_v42  ;;  %v1095_v56 = vsel %vm345_vm1, %v1077_v20, 0.0  ;;  %v1084_v38 = vmul.f32 %v4178_v51, %v4316_v48  ;;  %v5133_v48 = vld [vmem:[#allocation5_spill] sm:$0xff] }
 0x421   : > { %v1110_v42 = vsel %vm345_vm1, %v1082_v35, 0.0  ;;  %v1087_v51 = vmul.f32 %v5131_v47, %v4201_v60  ;;  %v5138_v60 = vld [vmem:[#allocation8_spill] sm:$0xff] }
 0x422   : > { %v3767_v24 = vpop.eup %3766  ;;  %3579 = vmatprep.subr.bf16.mxu1 %v3578_v23  ;;  %v1116_v45 = vsel %vm345_vm1, %v1084_v38, 0.0 }
 0x423   : > { %v3769_v31 = vpop.eup %3768  ;;  %3581 = vmatpush3.bf16.msra.mxu1 %v3578_v23  ;;  %v1104_v23 = vsel %vm345_vm1, %v1080_v49, 0.0 }
 0x424   : > { %v3582_v0 = vpack.c.bf16 %v3767_v24, %v3769_v31  ;;  %v1088_v24 = vmul.f32 %v5133_v48, %v5132_v43 }
 0x425   : > { %3553 = vmatpush3.bf16.xpose.msk.msra.mxu0 %vm4491_vm6, %v3548_v2  ;;  %v1078_v2 = vmul.f32 %v4125_v26, %v4304_v39  ;;  %v1081_v26 = vmul.f32 %v4306_v40, %v4153_v41  ;;  %v1101_v39 = vsel %vm345_vm1, %v1079_v36, 0.0  ;;  %v1085_v41 = vmul.f32 %v4314_v46, %v4187_v55  ;;  %v5134_v55 = vld [vmem:[#allocation6_spill] sm:$0xff] }
 0x426   : > { %3584 = vmatprep.subr.msk.bf16.mxu1 %vm3583_vm9, %v3582_v0  ;;  %v1113_v40 = vsel %vm345_vm1, %v1083_v34, 0.0  ;;  %v1089_v46 = vmul.f32 %v5135_v57, %v5134_v55 }
 0x427   : > { %3587 = vmatpush3.bf16.msk.msra.mxu1 %vm3583_vm9, %v3582_v0  ;;  %v1098_v21 = vsel %vm345_vm1, %v1078_v2, 0.0  ;;  %v1107_v37 = vsel %vm345_vm1, %v1081_v26, 0.0  ;;  %v1119_v31 = vsel %vm345_vm1, %v1085_v41, 0.0  ;;  %v1122_v0 = vsel %vm345_vm1, %v1086_v44, 0.0 }
 0x42c   : > { %3405 = vmatmul.mubr.msk.f32.vlgmr.msra.gmra.mrb[32].mxu0 %vm340_vm0, %v4390_v32 }
 0x42d   : > { %3407 = vmatprep.mubr.msk.f32.mxu0 %vm340_vm0, %v4402_v16 }
 0x430   : > { %3408 = vmatmul.mubr.msk.f32.gmra.mrb[34].mxu0 %vm340_vm0, %v4400_v11 }
 0x431   : > { %3410 = vmatprep.mubr.msk.f32.mxu0 %vm340_vm0, %v4410_v22 }
 0x434   : > { %3411 = vmatmul.mubr.msk.f32.gmra.mrb[36].mxu0 %vm340_vm0, %v4408_v17 }
 0x435   : > { %3413 = vmatprep.mubr.msk.f32.mxu0 %vm340_vm0, %v4420_v28 }
 0x438   : > { %3414 = vmatmul.mubr.msk.f32.gmra.mrb[38].mxu0 %vm340_vm0, %v4416_v25 }
 0x439   : > { %3416 = vmatprep.mubr.msk.f32.mxu0 %vm340_vm0, %v4428_v3 }
 0x43c   : > { %3417 = vmatmul.mubr.msk.f32.gmra.mrb[40].mxu0 %vm340_vm0, %v4422_v7 }
 0x43d   : > { %3419 = vmatprep.mubr.msk.f32.mxu0 %vm340_vm0, %v4436_v6 }
 0x440   : > { %3420 = vmatmul.mubr.msk.f32.gmra.mrb[42].mxu0 %vm340_vm0, %v4430_v5 }
 0x441   : > { %3422 = vmatprep.mubr.msk.f32.mxu0 %vm340_vm0, %v4444_v9 }
 0x444   : > { %3423 = vmatmul.mubr.msk.f32.gmra.mrb[44].mxu0 %vm340_vm0, %v4438_v1 }
 0x445   : > { %3425 = vmatprep.mubr.msk.f32.mxu0 %vm340_vm0, %v4450_v12 }
 0x448   : > { %3426 = vmatmul.mubr.msk.f32.gmra.mrb[46].mxu0 %vm340_vm0, %v4448_v10 }
 0x4ff   : > { %v4580_v32 = vpop.f32.mrb[32].mxu0 }
 0x500   : > { %v4582_v11 = vpop.f32.mrb[33].mxu0  ;;  %v2246_v16 = vsel %vm2242_vm10, %v4580_v32, -inf }
 0x501   : > { %2247 = vmax.xlane.f32.xlu1 %v2246_v16  ;;  %v2243_v17 = vsel %vm2242_vm10, %v4582_v11, -inf  ;;  %v5137_v16 = vld [vmem:[#allocation14_spill] sm:$0xff] }
 0x502   : > { %2244 = vmax.xlane.f32.xlu0 %v2243_v17  ;;  %v1090_v17 = vmul.f32 %v5137_v16, %v5136_v50 }
 0x503   : > { %v4588_v22 = vpop.f32.mrb[34].mxu0 }
 0x504   : > { %v4590_v25 = vpop.f32.mrb[35].mxu0  ;;  %v2252_v5 = vsel %vm2242_vm10, %v4588_v22, -inf }
 0x505   : > { %v2249_v28 = vsel %vm2242_vm10, %v4590_v25, -inf }
 0x506   : > { %2250 = vmax.xlane.f32.xlu0 %v2249_v28  ;;  %v1125_v28 = vsel %vm345_vm1, %v1087_v51, 0.0 }
 0x507   : > { %v4594_v7 = vpop.f32.mrb[36].mxu0 }
 0x508   : > { %v4596_v3 = vpop.f32.mrb[37].mxu0  ;;  %v2258_v10 = vsel %vm2242_vm10, %v4594_v7, -inf }
 0x509   : > { %v2255_v6 = vsel %vm2242_vm10, %v4596_v3, -inf }
 0x50a   : > { %2253 = vmax.xlane.f32.xlu0 %v2252_v5  ;;  %2256 = vmax.xlane.f32.xlu1 %v2255_v6  ;;  %v1128_v5 = vsel %vm345_vm1, %v1088_v24, 0.0  ;;  %v5139_v6 = vld [vmem:[#allocation13_spill] sm:$0xff] }
 0x50b   : > { %v4602_v1 = vpop.f32.mrb[38].mxu0 }
 0x50c   : > { %v4604_v9 = vpop.f32.mrb[39].mxu0  ;;  %v2264_v4 = vsel %vm2242_vm10, %v4602_v1, -inf }
 0x50d   : > { %v2261_v12 = vsel %vm2242_vm10, %v4604_v9, -inf }
 0x50e   : > { %2259 = vmax.xlane.f32.xlu0 %v2258_v10  ;;  %2262 = vmax.xlane.f32.xlu1 %v2261_v12  ;;  %v1091_v10 = vmul.f32 %v5139_v6, %v5138_v60  ;;  %v1131_v12 = vsel %vm345_vm1, %v1089_v46, 0.0 }
 0x50f   : > { %v4610_v27 = vpop.f32.mrb[40].mxu0 }
 0x510   : > { %v4612_v19 = vpop.f32.mrb[41].mxu0  ;;  %v2270_v63 = vsel %vm2242_vm10, %v4610_v27, -inf }
 0x511   : > { %v2267_v58 = vsel %vm2242_vm10, %v4612_v19, -inf }
 0x512   : > { %2265 = vmax.xlane.f32.xlu0 %v2264_v4  ;;  %2268 = vmax.xlane.f32.xlu1 %v2267_v58  ;;  %v1134_v4 = vsel %vm345_vm1, %v1090_v17, 0.0  ;;  %v1138_v58 = vsel %vm1137_vm12, %v1091_v10, 0.0 }
 0x513   : > { %v4618_v14 = vpop.f32.mrb[42].mxu0 }
 0x514   : > { %v4620_v53 = vpop.f32.mrb[43].mxu0  ;;  %v2276_v15 = vsel %vm2242_vm10, %v4618_v14, -inf }
 0x515   : > { %v2273_v33 = vsel %vm2242_vm10, %v4620_v53, -inf }
 0x516   : > { %2271 = vmax.xlane.f32.xlu0 %v2270_v63  ;;  %2274 = vmax.xlane.f32.xlu1 %v2273_v33 }
 0x517   : > { %v4626_v52 = vpop.f32.mrb[44].mxu0 }
 0x518   : > { %v4628_v29 = vpop.f32.mrb[45].mxu0  ;;  %v2282_v59 = vsel %vm2242_vm10, %v4626_v52, -inf }
 0x519   : > { %v2279_v62 = vsel %vm2242_vm10, %v4628_v29, -inf }
 0x51a   : > { %2277 = vmax.xlane.f32.xlu0 %v2276_v15  ;;  %2280 = vmax.xlane.f32.xlu1 %v2279_v62 }
 0x51b   : > { %v4634_v54 = vpop.f32.mrb[46].mxu0 }
 0x51c   : > { %v4636_v13 = vpop.f32.mrb[47].mxu0  ;;  %v2289_v30 = vsel %vm2288_vm11, %v4634_v54, -inf }
 0x51d   : > { %v2285_v18 = vsel %vm2242_vm10, %v4636_v13, -inf }
 0x51e   : > { %2283 = vmax.xlane.f32.xlu0 %v2282_v59  ;;  %2286 = vmax.xlane.f32.xlu1 %v2285_v18 }
 0x522   : > { %2290 = vmax.xlane.f32.xlu0 %v2289_v30  ;;  %1093 = vadd.xlane.f32.xlu1 %v1092_v8 }
 0x526   : > { %1096 = vadd.xlane.f32.xlu0 %v1095_v56  ;;  %1099 = vadd.xlane.f32.xlu1 %v1098_v21 }
 0x52a   : > { %1102 = vadd.xlane.f32.xlu0 %v1101_v39  ;;  %1105 = vadd.xlane.f32.xlu1 %v1104_v23 }
 0x52e   : > { %1108 = vadd.xlane.f32.xlu0 %v1107_v37  ;;  %1111 = vadd.xlane.f32.xlu1 %v1110_v42 }
 0x532   : > { %1114 = vadd.xlane.f32.xlu0 %v1113_v40  ;;  %1117 = vadd.xlane.f32.xlu1 %v1116_v45 }
 0x536   : > { %1120 = vadd.xlane.f32.xlu0 %v1119_v31  ;;  %1123 = vadd.xlane.f32.xlu1 %v1122_v0 }
 0x53a   : > { %1126 = vadd.xlane.f32.xlu0 %v1125_v28  ;;  %1129 = vadd.xlane.f32.xlu1 %v1128_v5 }
 0x53e   : > { %1132 = vadd.xlane.f32.xlu0 %v1131_v12  ;;  %1135 = vadd.xlane.f32.xlu1 %v1134_v4 }
 0x542   : > { %1139 = vadd.xlane.f32.xlu0 %v1138_v58 }
 0x58e   : > { %v2248_v63 = vpop.xlane.xlu1 %2247 }
 0x58f   : > { %v2293_v33 = vsub.f32 %v4580_v32, %v2248_v63  ;;  %v2245_v15 = vpop.xlane.xlu0 %2244 }
 0x590   : > { %v2292_v62 = vsub.f32 %v4582_v11, %v2245_v15 }
 0x591   : > { %v2310_v61 = vmul.f32 1.442695, %v2293_v33 }
 0x592   : > { %v2308_v59 = vmul.f32 1.442695, %v2292_v62 }
 0x593   : > { %3770 = vpow2.f32 %v2310_v61  ;;  %v2251_v18 = vpop.xlane.xlu0 %2250 }
 0x594   : > { %3772 = vpow2.f32 %v2308_v59  ;;  %v2294_v20 = vsub.f32 %v4590_v25, %v2251_v18 }
 0x596   : > { %v2312_v2 = vmul.f32 1.442695, %v2294_v20 }
 0x597   : > { %v2254_v30 = vpop.xlane.xlu0 %2253  ;;  %v2257_v8 = vpop.xlane.xlu1 %2256 }
 0x598   : > { %3774 = vpow2.f32 %v2312_v2  ;;  %v2295_v36 = vsub.f32 %v4588_v22, %v2254_v30  ;;  %v2296_v49 = vsub.f32 %v4596_v3, %v2257_v8 }
 0x59a   : > { %v2314_v56 = vmul.f32 1.442695, %v2295_v36  ;;  %v2316_v32 = vmul.f32 1.442695, %v2296_v49 }
 0x59b   : > { %v2260_v21 = vpop.xlane.xlu0 %2259  ;;  %v2263_v26 = vpop.xlane.xlu1 %2262 }
 0x59c   : > { %3776 = vpow2.f32 %v2314_v56  ;;  %v2297_v11 = vsub.f32 %v4594_v7, %v2260_v21  ;;  %v2298_v35 = vsub.f32 %v4604_v9, %v2263_v26 }
 0x59d   : > { %v3771_v39 = vpop.eup %3770  ;;  %3778 = vpow2.f32 %v2316_v32 }
 0x59e   : > { %v3773_v25 = vpop.eup %3772  ;;  %v2318_v23 = vmul.f32 1.442695, %v2297_v11  ;;  %v2320_v34 = vmul.f32 1.442695, %v2298_v35  ;;  %v2540_v38 = vsel %vm2242_vm10, %v3771_v39, 0.0 }
 0x59f   : > { %3460 = vmatprep.mubr.msk.f32.mxu1 %vm2242_vm10, %v3773_v25  ;;  %v2266_v22 = vpop.xlane.xlu0 %2265  ;;  %v2269_v3 = vpop.xlane.xlu1 %2268  ;;  %2541 = vadd.xlane.f32.xlu0 %v2540_v38  ;;  %v2537_v37 = vsel %vm2242_vm10, %v3773_v25, 0.0 }
 0x5a0   : > { %3780 = vpow2.f32 %v2318_v23  ;;  %v2299_v42 = vsub.f32 %v4602_v1, %v2266_v22  ;;  %v2300_v7 = vsub.f32 %v4612_v19, %v2269_v3  ;;  %3461 = vmatmul.mubr.msk.f32.vlgmr.msra.gmra.mrb[50].mxu1 %vm2242_vm10, %v3771_v39  ;;  %2538 = vadd.xlane.f32.xlu1 %v2537_v37  ;;  %v5140_v37 = vld [vmem:[#allocation16_spill] sm:$0xff] }
 0x5a1   : > { %3782 = vpow2.f32 %v2320_v34 }
 0x5a2   : > { %v3775_v9 = vpop.eup %3774  ;;  %v2322_v41 = vmul.f32 1.442695, %v2299_v42  ;;  %v2324_v44 = vmul.f32 1.442695, %v2300_v7  ;;  %v4740_v42 = vmul.f32 0.001953125, %v5140_v37  ;;  %v5150_v37 = vld [vmem:[#allocation26_spill] sm:$0xff] }
 0x5a3   : > { %3463 = vmatprep.mubr.msk.f32.mxu1 %vm2242_vm10, %v3775_v9  ;;  %v2272_v40 = vpop.xlane.xlu0 %2271  ;;  %v2275_v45 = vpop.xlane.xlu1 %2274  ;;  %v2543_v47 = vsel %vm2242_vm10, %v3775_v9, 0.0 }
 0x5a4   : > { %3784 = vpow2.f32 %v2322_v41  ;;  %v2301_v51 = vsub.f32 %v4610_v27, %v2272_v40  ;;  %v2302_v1 = vsub.f32 %v4620_v53, %v2275_v45  ;;  %2544 = vadd.xlane.f32.xlu1 %v2543_v47  ;;  %v5141_v41 = vld [vmem:[#allocation15_spill] sm:$0xff]  ;;  %v1157_v45 = vmul.f32 %v4740_v42, %v4740_v42 }
 0x5a5   : > { %3786 = vpow2.f32 %v2324_v44  ;;  %v4743_v44 = vmul.f32 0.001953125, %v5141_v41 }
 0x5a6   : > { %v3777_v19 = vpop.eup %3776  ;;  %v2326_v43 = vmul.f32 1.442695, %v2301_v51  ;;  %v2328_v48 = vmul.f32 1.442695, %v2302_v1 }
 0x5a7   : > { %v3779_v24 = vpop.eup %3778  ;;  %3464 = vmatmul.mubr.msk.f32.gmra.mrb[52].mxu1 %vm2242_vm10, %v3777_v19  ;;  %v2278_v31 = vpop.xlane.xlu0 %2277  ;;  %v2546_v55 = vsel %vm2242_vm10, %v3777_v19, 0.0  ;;  %v1158_v1 = vmul.f32 %v4743_v44, %v4743_v44  ;;  %v5142_v19 = vld [vmem:[#allocation17_spill] sm:$0xff] }
 0x5a8   : > { %v2281_v0 = vpop.xlane.xlu1 %2280  ;;  %3788 = vpow2.f32 %v2326_v43  ;;  %v2303_v57 = vsub.f32 %v4618_v14, %v2278_v31  ;;  %3466 = vmatprep.mubr.msk.f32.mxu1 %vm2242_vm10, %v3779_v24  ;;  %2547 = vadd.xlane.f32.xlu0 %v2546_v55  ;;  %v2549_v27 = vsel %vm2242_vm10, %v3779_v24, 0.0  ;;  %v4752_v43 = vmul.f32 0.001953125, %v5142_v19  ;;  %v5143_v55 = vld [vmem:[#allocation18_spill] sm:$0xff] }
 0x5a9   : > { %v2304_v46 = vsub.f32 %v4628_v29, %v2281_v0  ;;  %3790 = vpow2.f32 %v2328_v48  ;;  %2550 = vadd.xlane.f32.xlu1 %v2549_v27 }
 0x5aa   : > { %v3781_v53 = vpop.eup %3780  ;;  %v2330_v50 = vmul.f32 1.442695, %v2303_v57  ;;  %v4759_v57 = vmul.f32 0.001953125, %v5143_v55  ;;  %v1160_v27 = vmul.f32 %v4752_v43, %v4752_v43 }
 0x5ab   : > { %v2332_v16 = vmul.f32 1.442695, %v2304_v46  ;;  %v3783_v17 = vpop.eup %3782  ;;  %3467 = vmatmul.mubr.msk.f32.gmra.mrb[54].mxu1 %vm2242_vm10, %v3781_v53  ;;  %v2284_v28 = vpop.xlane.xlu0 %2283  ;;  %v2552_v60 = vsel %vm2242_vm10, %v3781_v53, 0.0  ;;  %v5144_v53 = vld [vmem:[#allocation20_spill] sm:$0xff] }
 0x5ac   : > { %v2287_v5 = vpop.xlane.xlu1 %2286  ;;  %3792 = vpow2.f32 %v2330_v50  ;;  %v2305_v14 = vsub.f32 %v4626_v52, %v2284_v28  ;;  %3469 = vmatprep.mubr.msk.f32.mxu1 %vm2242_vm10, %v3783_v17  ;;  %2553 = vadd.xlane.f32.xlu0 %v2552_v60  ;;  %v2555_v6 = vsel %vm2242_vm10, %v3783_v17, 0.0  ;;  %v4764_v50 = vmul.f32 0.001953125, %v5144_v53 }
 0x5ad   : > { %v2306_v29 = vsub.f32 %v4636_v13, %v2287_v5  ;;  %3794 = vpow2.f32 %v2332_v16  ;;  %2556 = vadd.xlane.f32.xlu1 %v2555_v6  ;;  %v5145_v16 = vld [vmem:[#allocation19_spill] sm:$0xff] }
 0x5ae   : > { %v3785_v10 = vpop.eup %3784  ;;  %v2334_v12 = vmul.f32 1.442695, %v2305_v14  ;;  %v4767_v17 = vmul.f32 0.001953125, %v5145_v16 }
 0x5af   : > { %v2336_v4 = vmul.f32 1.442695, %v2306_v29  ;;  %v3787_v58 = vpop.eup %3786  ;;  %3470 = vmatmul.mubr.msk.f32.gmra.mrb[56].mxu1 %vm2242_vm10, %v3785_v10  ;;  %v2291_v63 = vpop.xlane.xlu0 %2290  ;;  %v2558_v33 = vsel %vm2242_vm10, %v3785_v10, 0.0  ;;  %v1159_v29 = vmul.f32 %v4759_v57, %v4759_v57 }
 0x5b0   : > { %3796 = vpow2.f32 %v2334_v12  ;;  %v2307_v52 = vsub.f32 %v4634_v54, %v2291_v63  ;;  %3472 = vmatprep.mubr.msk.f32.mxu1 %vm2242_vm10, %v3787_v58  ;;  %2559 = vadd.xlane.f32.xlu0 %v2558_v33  ;;  %v2561_v13 = vsel %vm2242_vm10, %v3787_v58, 0.0  ;;  %v1094_v26 = vpop.xlane.xlu1 %1093  ;;  %v1162_v63 = vmul.f32 %v4767_v17, %v4767_v17  ;;  %v5146_v33 = vld [vmem:[#allocation21_spill] sm:$0xff] }
 0x5b1   : > { %3798 = vpow2.f32 %v2336_v4  ;;  %2562 = vadd.xlane.f32.xlu1 %v2561_v13  ;;  %v1141_v7 = vmul.f32 0.001953125, %v1094_v26  ;;  %v1161_v4 = vmul.f32 %v4764_v50, %v4764_v50  ;;  %v5147_v13 = vld [vmem:[#allocation22_spill] sm:$0xff] }
 0x5b2   : > { %v3789_v15 = vpop.eup %3788  ;;  %v2338_v62 = vmul.f32 1.442695, %v2307_v52  ;;  %v4780_v52 = vmul.f32 0.001953125, %v5146_v33 }
 0x5b3   : > { %v3791_v61 = vpop.eup %3790  ;;  %3473 = vmatmul.mubr.msk.f32.gmra.mrb[58].mxu1 %vm2242_vm10, %v3789_v15  ;;  %v2564_v59 = vsel %vm2242_vm10, %v3789_v15, 0.0  ;;  %v1097_v11 = vpop.xlane.xlu0 %1096  ;;  %v1173_v51 = vsub.f32 %v1141_v7, %v1157_v45  ;;  %v4783_v15 = vmul.f32 0.001953125, %v5147_v13  ;;  %v4798_v7 = vmul.f32 0.001953125, %v5150_v37 }
 0x5b4   : > { %3800 = vpow2.f32 %v2338_v62  ;;  %3475 = vmatprep.mubr.msk.f32.mxu1 %vm2242_vm10, %v3791_v61  ;;  %2565 = vadd.xlane.f32.xlu0 %v2564_v59  ;;  %v2567_v54 = vsel %vm2242_vm10, %v3791_v61, 0.0  ;;  %v1100_v35 = vpop.xlane.xlu1 %1099  ;;  %v1142_v47 = vmul.f32 0.001953125, %v1097_v11 }
 0x5b5   : > { %2568 = vadd.xlane.f32.xlu1 %v2567_v54  ;;  %v1189_v46 = vmax.f32 %v1173_v51, 0.0  ;;  %v1143_v28 = vmul.f32 0.001953125, %v1100_v35  ;;  %v1163_v26 = vmul.f32 %v4783_v15, %v4783_v15  ;;  %v1167_v53 = vmul.f32 %v4798_v7, %v4798_v7 }
 0x5b6   : > { %v3793_v18 = vpop.eup %3792  ;;  %v1174_v24 = vsub.f32 %v1142_v47, %v1158_v1  ;;  %v5151_v47 = vld [vmem:[#allocation25_spill] sm:$0xff] }
 0x5b7   : > { %v3795_v20 = vpop.eup %3794  ;;  %3476 = vmatmul.mubr.msk.f32.gmra.mrb[60].mxu1 %vm2242_vm10, %v3793_v18  ;;  %v2570_v2 = vsel %vm2242_vm10, %v3793_v18, 0.0  ;;  %v1103_v39 = vpop.xlane.xlu0 %1102  ;;  %v1205_v6 = vadd.f32 1e-05, %v1189_v46  ;;  %v1175_v62 = vsub.f32 %v1143_v28, %v1159_v29  ;;  %v5148_v18 = vld [vmem:[#allocation24_spill] sm:$0xff]  ;;  %v4803_v51 = vmul.f32 0.001953125, %v5151_v47 }
 0x5b8   : > { %3478 = vmatprep.mubr.msk.f32.mxu1 %vm2242_vm10, %v3795_v20  ;;  %2571 = vadd.xlane.f32.xlu0 %v2570_v2  ;;  %v2573_v30 = vsel %vm2242_vm10, %v3795_v20, 0.0  ;;  %v1106_v25 = vpop.xlane.xlu1 %1105  ;;  %v1144_v31 = vmul.f32 0.001953125, %v1103_v39  ;;  %v1190_v5 = vmax.f32 %v1174_v24, 0.0  ;;  %v4786_v20 = vmul.f32 0.001953125, %v5148_v18 }
 0x5b9   : > { %2574 = vadd.xlane.f32.xlu1 %v2573_v30  ;;  %v1145_v14 = vmul.f32 0.001953125, %v1106_v25  ;;  %3802 = vrsqrt.f32 %v1205_v6  ;;  %v1191_v11 = vmax.f32 %v1175_v62, 0.0  ;;  %v1237_v6 = vld [vmem:[%s5090_s2] sm:$0xff] }
 0x5ba   : > { %v3797_v8 = vpop.eup %3796  ;;  %v1176_v60 = vsub.f32 %v1144_v31, %v1160_v27  ;;  %v1206_v61 = vadd.f32 1e-05, %v1190_v5  ;;  %v1168_v5 = vmul.f32 %v4803_v51, %v4803_v51 }
 0x5bb   : > { %v3799_v36 = vpop.eup %3798  ;;  %3479 = vmatmul.mubr.msk.f32.gmra.mrb[62].mxu1 %vm2242_vm10, %v3797_v8  ;;  %v2576_v49 = vsel %vm2242_vm10, %v3797_v8, 0.0  ;;  %v1109_v23 = vpop.xlane.xlu0 %1108  ;;  %v1177_v54 = vsub.f32 %v1145_v14, %v1161_v4  ;;  %v1207_v19 = vadd.f32 1e-05, %v1191_v11 }
 0x5bc   : > { %2577 = vadd.xlane.f32.xlu0 %v2576_v49  ;;  %3481 = vmatprep.mubr.msk.f32.mxu1 %vm2242_vm10, %v3799_v36  ;;  %v2579_v56 = vsel %vm2242_vm10, %v3799_v36, 0.0  ;;  %v1112_v34 = vpop.xlane.xlu1 %1111  ;;  %v1146_v10 = vmul.f32 0.001953125, %v1109_v23  ;;  %v1192_v59 = vmax.f32 %v1176_v60, 0.0  ;;  %v5149_v36 = vld [vmem:[#allocation23_spill] sm:$0xff]  ;;  %3804 = vrsqrt.f32 %v1206_v61 }
 0x5bd   : > { %2580 = vadd.xlane.f32.xlu1 %v2579_v56  ;;  %v1147_v30 = vmul.f32 0.001953125, %v1112_v34  ;;  %v4789_v49 = vmul.f32 0.001953125, %v5149_v36  ;;  %v1193_v25 = vmax.f32 %v1177_v54, 0.0  ;;  %v1165_v34 = vmul.f32 %v4786_v20, %v4786_v20 }
 0x5be   : > { %v3801_v32 = vpop.eup %3800  ;;  %v1178_v2 = vsub.f32 %v1146_v10, %v1162_v63  ;;  %v1208_v39 = vadd.f32 1e-05, %v1192_v59  ;;  %v5152_v63 = vld [vmem:[#allocation27_spill] sm:$0xff]  ;;  %v5153_v59 = vld [vmem:[#allocation28_spill] sm:$0xff] }
 0x5bf   : > { %3482 = vmatmul.mubr.msk.f32.gmra.mrb[64].mxu1 %vm2242_vm10, %v3801_v32  ;;  %v2582_v21 = vsel %vm2288_vm11, %v3801_v32, 0.0  ;;  %v1115_v38 = vpop.xlane.xlu0 %1114  ;;  %v1179_v41 = vsub.f32 %v1147_v30, %v1163_v26  ;;  %v1166_v45 = vmul.f32 %v4789_v49, %v4789_v49  ;;  %v1209_v55 = vadd.f32 1e-05, %v1193_v25  ;;  %v5154_v25 = vld [vmem:[#allocation29_spill] sm:$0xff] }
 0x5c0   : > { %2583 = vadd.xlane.f32.xlu0 %v2582_v21  ;;  %v1118_v22 = vpop.xlane.xlu1 %1117  ;;  %v1148_v56 = vmul.f32 0.001953125, %v1115_v38  ;;  %v1164_v21 = vmul.f32 %v4780_v52, %v4780_v52  ;;  %v1194_v38 = vmax.f32 %v1178_v2, 0.0  ;;  %3806 = vrsqrt.f32 %v1208_v39  ;;  %v1238_v2 = vld [vmem:[%s5090_s2 + $0x8] sm:$0xff] }
 0x5c1   : > { %v1149_v35 = vmul.f32 0.001953125, %v1118_v22  ;;  %v1195_v28 = vmax.f32 %v1179_v41, 0.0  ;;  %3808 = vrsqrt.f32 %v1207_v19  ;;  %v4820_v33 = vmul.f32 0.001953125, %v5152_v63 }
 0x5c2   : > { %v1180_v1 = vsub.f32 %v1148_v56, %v1164_v21  ;;  %v1210_v16 = vadd.f32 1e-05, %v1194_v38  ;;  %3810 = vrsqrt.f32 %v1209_v55  ;;  %v4825_v54 = vmul.f32 0.001953125, %v5153_v59  ;;  %v5155_v38 = vld [vmem:[#allocation30_spill] sm:$0xff] }
 0x5c3   : > { %v1121_v3 = vpop.xlane.xlu0 %1120  ;;  %v1181_v24 = vsub.f32 %v1149_v35, %v1165_v34  ;;  %v3803_v14 = vpop.eup %3802  ;;  %v1211_v13 = vadd.f32 1e-05, %v1195_v28  ;;  %v1170_v39 = vmul.f32 %v4820_v33, %v4820_v33  ;;  %v4842_v41 = vmul.f32 0.001953125, %v5155_v38 }
 0x5c4   : > { %v1124_v9 = vpop.xlane.xlu1 %1123  ;;  %v1150_v23 = vmul.f32 0.001953125, %v1121_v3  ;;  %v1196_v60 = vmax.f32 %v1180_v1, 0.0  ;;  %3812 = vrsqrt.f32 %v1210_v16  ;;  %v4830_v30 = vmul.f32 %v3803_v14, %v1237_v6 }
 0x5c5   : > { %v1151_v3 = vmul.f32 0.001953125, %v1124_v9  ;;  %v1197_v29 = vmax.f32 %v1181_v24, 0.0  ;;  %v1169_v37 = vmul.f32 %v4825_v54, %v4825_v54 }
 0x5c6   : > { %v1182_v46 = vsub.f32 %v1150_v23, %v1166_v45  ;;  %v3805_v61 = vpop.eup %3804  ;;  %v1212_v18 = vadd.f32 1e-05, %v1196_v60 }
 0x5c7   : > { %v4745_v40 = vpop.xlane.xlu0 %1126  ;;  %v1183_v9 = vsub.f32 %v1151_v3, %v1167_v53  ;;  %v1213_v36 = vadd.f32 1e-05, %v1197_v29  ;;  %v1254_v23 = vmul.f32 %v3805_v61, %v1238_v2  ;;  %v1242_v29 = vld [vmem:[%s5090_s2 + $0x28] sm:$0xff] }
 0x5c8   : > { %v4754_v48 = vpop.xlane.xlu1 %1129  ;;  %v1152_v27 = vmul.f32 0.001953125, %v4745_v40  ;;  %v1198_v10 = vmax.f32 %v1182_v46, 0.0  ;;  %v1269_v46 = vld [vmem:[%s5091_s3] sm:$0xff] }
 0x5c9   : > { %v1199_v56 = vmax.f32 %v1183_v9, 0.0  ;;  %v1153_v35 = vmul.f32 0.001953125, %v4754_v48  ;;  %v1285_v48 = vmul.f32 %v4830_v30, %v4740_v42  ;;  %v1286_v53 = vmul.f32 %v1254_v23, %v4743_v44  ;;  %v1241_v9 = vld [vmem:[%s5090_s2 + $0x20] sm:$0xff] }
 0x5ca   : > { %v1184_v40 = vsub.f32 %v1152_v27, %v1168_v5  ;;  %v1214_v26 = vadd.f32 1e-05, %v1198_v10  ;;  %v3807_v34 = vpop.eup %3806  ;;  %v1270_v5 = vld [vmem:[%s5091_s3 + $0x8] sm:$0xff] }
 0x5cb   : > { %v4756_v0 = vpop.xlane.xlu0 %1132  ;;  %v1215_v45 = vadd.f32 1e-05, %v1199_v56  ;;  %v1185_v3 = vsub.f32 %v1153_v35, %v1169_v37  ;;  %v3809_v42 = vpop.eup %3808  ;;  %v1301_v14 = vsub.f32 %v1269_v46, %v1285_v48 }
 0x5cc   : > { %v4771_v12 = vpop.xlane.xlu1 %1135  ;;  %v1154_v21 = vmul.f32 0.001953125, %v4756_v0  ;;  %v1200_v11 = vmax.f32 %v1184_v40, 0.0  ;;  %v3811_v28 = vpop.eup %3810 }
 0x5cd   : > { %v1155_v55 = vmul.f32 0.001953125, %v4771_v12  ;;  %v1171_v12 = vmul.f32 %v4842_v41, %v4842_v41 }
 0x5ce   : > { %v1186_v47 = vsub.f32 %v1154_v21, %v1170_v39  ;;  %v1216_v24 = vadd.f32 1e-05, %v1200_v11  ;;  %v3813_v60 = vpop.eup %3812  ;;  %v4883_v11 = vmul.f32 %v3811_v28, %v1241_v9 }
 0x5cf   : > { %v4775_v58 = vpop.xlane.xlu0 %1139  ;;  %v1187_v10 = vsub.f32 %v1155_v55, %v1171_v12 }
 0x5d0   : > { %v1156_v1 = vmul.f32 0.001953125, %v4775_v58  ;;  %v1239_v58 = vld [vmem:[%s5090_s2 + $0x10] sm:$0xff] }
 0x5d1   : > { %v1203_v48 = vmax.f32 %v1187_v10, 0.0 }
 0x62c   : > { %v2542_v32 = vpop.xlane.xlu0 %2541 }
 0x62d   : > { %v2539_v8 = vpop.xlane.xlu1 %2538  ;;  %3814 = vrcp.f32 %v2542_v32  ;;  %v4837_v32 = vmul.f32 0.001953125, %v5154_v25 }
 0x62e   : > { %3816 = vrcp.f32 %v2539_v8  ;;  %v1240_v8 = vld [vmem:[%s5090_s2 + $0x18] sm:$0xff] }
 0x62f   : > { %3818 = vrsqrt.f32 %v1211_v13  ;;  %v1172_v27 = vmul.f32 %v4837_v32, %v4837_v32  ;;  %v4858_v16 = vmul.f32 %v3807_v34, %v1240_v8  ;;  %v4875_v13 = vmul.f32 %v3809_v42, %v1239_v58 }
 0x630   : > { %3820 = vrsqrt.f32 %v1212_v18  ;;  %v1302_v18 = vsub.f32 %v1270_v5, %v1286_v53  ;;  %v1289_v53 = vmul.f32 %v4883_v11, %v4764_v50  ;;  %v1273_v5 = vld [vmem:[%s5091_s3 + $0x20] sm:$0xff]  ;;  %v1246_v50 = vld [vmem:[%s5090_s2 + $0x48] sm:$0xff] }
 0x631   : > { %v4807_v31 = vpop.xlane.xlu1 %2544  ;;  %3822 = vrsqrt.f32 %v1213_v36  ;;  %v1188_v44 = vsub.f32 %v1156_v1, %v1172_v27  ;;  %v1288_v56 = vmul.f32 %v4858_v16, %v4752_v43  ;;  %v1272_v43 = vld [vmem:[%s5091_s3 + $0x18] sm:$0xff] }
 0x632   : > { %3824 = vrsqrt.f32 %v1214_v26  ;;  %v4881_v26 = vmul.f32 %v3813_v60, %v1242_v29 }
 0x633   : > { %v1204_v25 = vmax.f32 %v1188_v44, 0.0  ;;  %v1304_v42 = vsub.f32 %v1272_v43, %v1288_v56 }
 0x635   : > { %v4805_v22 = vpop.xlane.xlu0 %2547 }
 0x636   : > { %v4822_v62 = vpop.xlane.xlu1 %2550  ;;  %3826 = vrcp.f32 %v4805_v22  ;;  %v1202_v22 = vmax.f32 %v1186_v47, 0.0  ;;  %v1287_v47 = vmul.f32 %v4875_v13, %v4759_v57  ;;  %v1220_v57 = vadd.f32 1e-05, %v1204_v25  ;;  %v1247_v25 = vld [vmem:[%s5090_s2 + $0x50] sm:$0xff] }
 0x637   : > { %3828 = vrcp.f32 %v4807_v31  ;;  %v3815_v6 = vpop.eup %3814  ;;  %v1201_v31 = vmax.f32 %v1185_v3, 0.0  ;;  %v1290_v3 = vmul.f32 %v4881_v26, %v4767_v17  ;;  %v1219_v17 = vadd.f32 1e-05, %v1203_v48 }
 0x638   : > { %3830 = vrsqrt.f32 %v1215_v45  ;;  %v3817_v61 = vpop.eup %3816  ;;  %v1218_v39 = vadd.f32 1e-05, %v1202_v22 }
 0x639   : > { %v4817_v4 = vpop.xlane.xlu0 %2553  ;;  %3832 = vrsqrt.f32 %v1216_v24  ;;  %v3819_v35 = vpop.eup %3818  ;;  %v1217_v38 = vadd.f32 1e-05, %v1201_v31 }
 0x63a   : > { %v2557_v19 = vpop.xlane.xlu1 %2556  ;;  %3834 = vrcp.f32 %v4817_v4  ;;  %v3821_v4 = vpop.eup %3820 }
 0x63b   : > { %3836 = vrcp.f32 %v4822_v62  ;;  %v3823_v62 = vpop.eup %3822 }
 0x63c   : > { %v3825_v1 = vpop.eup %3824 }
 0x63d   : > { %v2560_v0 = vpop.xlane.xlu0 %2559 }
 0x63e   : > { %v2563_v59 = vpop.xlane.xlu1 %2562  ;;  %3838 = vrcp.f32 %v2560_v0  ;;  %v1243_v0 = vld [vmem:[%s5090_s2 + $0x30] sm:$0xff] }
 0x63f   : > { %3840 = vrcp.f32 %v2557_v19  ;;  %v1274_v19 = vld [vmem:[%s5091_s3 + $0x28] sm:$0xff]  ;;  %v4912_v29 = vmul.f32 %v3819_v35, %v1243_v0 }
 0x640   : > { %v3827_v55 = vpop.eup %3826  ;;  %3842 = vrsqrt.f32 %v1218_v39  ;;  %v1306_v10 = vsub.f32 %v1274_v19, %v1290_v3  ;;  %v4926_v39 = vmul.f32 %v3825_v1, %v1246_v50 }
 0x641   : > { %v2566_v40 = vpop.xlane.xlu0 %2565  ;;  %v3829_v58 = vpop.eup %3828  ;;  %3844 = vrsqrt.f32 %v1217_v38 }
 0x642   : > { %v2569_v46 = vpop.xlane.xlu1 %2568  ;;  %v3831_v22 = vpop.eup %3830  ;;  %3846 = vrcp.f32 %v2566_v40  ;;  %v1245_v40 = vld [vmem:[%s5090_s2 + $0x40] sm:$0xff] }
 0x643   : > { %v3833_v9 = vpop.eup %3832  ;;  %3848 = vrcp.f32 %v2563_v59  ;;  %v1261_v38 = vmul.f32 %v3823_v62, %v1245_v40  ;;  %v4948_v62 = vmul.f32 %v3831_v22, %v1247_v25 }
 0x644   : > { %3850 = vrsqrt.f32 %v1220_v57 }
 0x645   : > { %v2572_v24 = vpop.xlane.xlu0 %2571  ;;  %3852 = vrsqrt.f32 %v1219_v17  ;;  %v1277_v17 = vld [vmem:[%s5091_s3 + $0x40] sm:$0xff] }
 0x646   : > { %3854 = vrcp.f32 %v2572_v24 }
 0x647   : > { %3856 = vrcp.f32 %v2569_v46 }
 0x673   : > { %v3462_v63 = vpop.f32.mrb[50].mxu1 }
 0x674   : > { %v2588_v2 = vmul.f32 %v3815_v6, %v3462_v63  ;;  %v2458_v36 = vpop.f32.mrb[51].mxu1  ;;  %v3835_v63 = vpop.eup %3834 }
 0x675   : > { %v2586_v21 = vmul.f32 %v3817_v61, %v2458_v36  ;;  %v1305_v36 = vsub.f32 %v1273_v5, %v1289_v53  ;;  %v3837_v56 = vpop.eup %3836 }
 0x676   : > { %v2618_v34 = vmul.f32 %v2588_v2, %v1254_v23  ;;  %v2634_v37 = vmul.f32 %v2588_v2, %v1302_v18  ;;  %v1244_v23 = vld [vmem:[%s5090_s2 + $0x38] sm:$0xff]  ;;  %v3839_v43 = vpop.eup %3838 }
 0x677   : > { %v2617_v8 = vmul.f32 %v2586_v21, %v4830_v30  ;;  %v2633_v45 = vmul.f32 %v2586_v21, %v1301_v14  ;;  %v1271_v30 = vld [vmem:[%s5091_s3 + $0x10] sm:$0xff]  ;;  %v4910_v60 = vmul.f32 %v3821_v4, %v1244_v23  ;;  %v2578_v21 = vpop.xlane.xlu0 %2577  ;;  %v1291_v4 = vmul.f32 %v4912_v29, %v4783_v15  ;;  %v3841_v1 = vpop.eup %3840 }
 0x678   : > { %2656 = vperm.xlu0 %3620, %v2618_v34   ;;  %2736 = vperm.xlu1 %3626, %v2634_v37   ;;  %v1303_v44 = vsub.f32 %v1271_v30, %v1287_v47  ;;  %v1276_v37 = vld [vmem:[%s5091_s3 + $0x38] sm:$0xff]  ;;  %3858 = vrcp.f32 %v2578_v21 }
 0x67a   : > { %v3465_v27 = vpop.f32.mrb[52].mxu1 }
 0x67b   : > { %v2592_v28 = vmul.f32 %v3827_v55, %v3465_v27  ;;  %v2468_v12 = vpop.f32.mrb[53].mxu1  ;;  %v3843_v55 = vpop.eup %3842  ;;  %v1250_v27 = vld [vmem:[%s5090_s2 + $0x68] sm:$0xff] }
 0x67c   : > { %v2590_v14 = vmul.f32 %v3829_v58, %v2468_v12  ;;  %2731 = vperm.xlu0 %3620, %v2633_v45   ;;  %2651 = vperm.xlu1 %3626, %v2617_v8   ;;  %v1275_v45 = vld [vmem:[%s5091_s3 + $0x30] sm:$0xff]  ;;  %v3845_v19 = vpop.eup %3844  ;;  %v1266_v40 = vmul.f32 %v3843_v55, %v1250_v27 }
 0x67d   : > { %v2620_v6 = vmul.f32 %v2592_v28, %v4858_v16  ;;  %v2636_v31 = vmul.f32 %v2592_v28, %v1304_v42  ;;  %v1292_v16 = vmul.f32 %v4910_v60, %v4780_v52  ;;  %v1248_v52 = vld [vmem:[%s5090_s2 + $0x58] sm:$0xff]  ;;  %v1307_v57 = vsub.f32 %v1275_v45, %v1291_v4  ;;  %v3847_v28 = vpop.eup %3846 }
 0x67e   : > { %v4922_v61 = vmul.f32 %v2590_v14, %v4875_v13  ;;  %v2635_v18 = vmul.f32 %v2590_v14, %v1303_v44  ;;  %v3468_v2 = vpop.f32.mrb[54].mxu1  ;;  %v2575_v13 = vpop.xlane.xlu1 %2574  ;;  %v1264_v0 = vmul.f32 %v3833_v9, %v1248_v52  ;;  %v1293_v42 = vmul.f32 %v1261_v38, %v4786_v20  ;;  %v1249_v20 = vld [vmem:[%s5090_s2 + $0x60] sm:$0xff] }
 0x67f   : > { %v2596_v59 = vmul.f32 %v3835_v63, %v3468_v2  ;;  %v2478_v35 = vpop.f32.mrb[55].mxu1  ;;  %v1308_v24 = vsub.f32 %v1276_v37, %v1292_v16  ;;  %3860 = vrcp.f32 %v2575_v13  ;;  %v3849_v14 = vpop.eup %3848  ;;  %v1265_v2 = vmul.f32 %v3845_v19, %v1249_v20 }
 0x680   : > { %v2594_v34 = vmul.f32 %v3837_v56, %v2478_v35  ;;  %2666 = vperm.xlu1 %3626, %v2620_v6   ;;  %2741 = vperm.xlu0 %3620, %v2635_v18   ;;  %v3851_v63 = vpop.eup %3850  ;;  %v1309_v18 = vsub.f32 %v1277_v17, %v1293_v42  ;;  %v1298_v45 = vmul.f32 %v1266_v40, %v4820_v33 }
 0x681   : > { %v4940_v48 = vmul.f32 %v2596_v59, %v4881_v26  ;;  %v4942_v8 = vmul.f32 %v2596_v59, %v1306_v10  ;;  %v1294_v26 = vmul.f32 %v4926_v39, %v4789_v49  ;;  %v2584_v49 = vpop.xlane.xlu0 %2583  ;;  %v1279_v10 = vld [vmem:[%s5091_s3 + $0x50] sm:$0xff] }
 0x682   : > { %v2621_v47 = vmul.f32 %v2594_v34, %v4883_v11  ;;  %v2637_v23 = vmul.f32 %v2594_v34, %v1305_v36  ;;  %v3471_v15 = vpop.f32.mrb[56].mxu1  ;;  %v1278_v11 = vld [vmem:[%s5091_s3 + $0x48] sm:$0xff]  ;;  %v2581_v12 = vpop.xlane.xlu1 %2580  ;;  %3862 = vrcp.f32 %v2584_v49  ;;  %v1251_v59 = vld [vmem:[%s5090_s2 + $0x70] sm:$0xff] }
 0x683   : > { %v2600_v30 = vmul.f32 %v3839_v43, %v3471_v15  ;;  %v2488_v3 = vpop.f32.mrb[57].mxu1  ;;  %v1310_v50 = vsub.f32 %v1278_v11, %v1294_v26  ;;  %v3853_v36 = vpop.eup %3852  ;;  %3864 = vrcp.f32 %v2581_v12  ;;  %v1283_v49 = vld [vmem:[%s5091_s3 + $0x70] sm:$0xff] }
 0x684   : > { %v2598_v46 = vmul.f32 %v3841_v1, %v2488_v3  ;;  %2746 = vperm.xlu1 %3626, %v2636_v31   ;;  %2671 = vperm.xlu0 %3620, %v2621_v47   ;;  %v1296_v31 = vmul.f32 %v1264_v0, %v4803_v51  ;;  %v1252_v51 = vld [vmem:[%s5090_s2 + $0x78] sm:$0x1f] }
 0x685   : > { %v4960_v53 = vmul.f32 %v2600_v30, %v4910_v60  ;;  %v4962_v58 = vmul.f32 %v2600_v30, %v1308_v24  ;;  %v1295_v60 = vmul.f32 %v4948_v62, %v4798_v7  ;;  %v1280_v7 = vld [vmem:[%s5091_s3 + $0x58] sm:$0xff]  ;;  %v1268_v43 = vmul.f32 %v3851_v63, %v1252_v51  ;;  %v1281_v24 = vld [vmem:[%s5091_s3 + $0x60] sm:$0xff] }
 0x686   : > { %v2623_v5 = vmul.f32 %v2598_v46, %v4912_v29  ;;  %v2639_v22 = vmul.f32 %v2598_v46, %v1307_v57  ;;  %v3474_v44 = vpop.f32.mrb[58].mxu1  ;;  %v1312_v37 = vsub.f32 %v1280_v7, %v1296_v31 }
 0x687   : > { %v2604_v9 = vmul.f32 %v3847_v28, %v3474_v44  ;;  %v2498_v6 = vpop.f32.mrb[59].mxu1  ;;  %v1311_v13 = vsub.f32 %v1279_v10, %v1295_v60  ;;  %v1300_v11 = vmul.f32 %v1268_v43, %v4837_v32 }
 0x688   : > { %v2602_v29 = vmul.f32 %v3849_v14, %v2498_v6  ;;  %2661 = vperm.xlu1 %3626, %v4922_v61   ;;  %2751 = vperm.xlu0 %3620, %v2637_v23   ;;  %v3855_v61 = vpop.eup %3854  ;;  %v1267_v23 = vmul.f32 %v3853_v36, %v1251_v59 }
 0x689   : > { %v2626_v56 = vmul.f32 %v2604_v9, %v4926_v39  ;;  %v2642_v21 = vmul.f32 %v2604_v9, %v1310_v50  ;;  %v3857_v34 = vpop.eup %3856  ;;  %v1282_v39 = vld [vmem:[%s5091_s3 + $0x68] sm:$0xff] }
 0x68a   : > { %v2625_v35 = vmul.f32 %v2602_v29, %v1261_v38  ;;  %v2641_v16 = vmul.f32 %v2602_v29, %v1309_v18  ;;  %v3477_v25 = vpop.f32.mrb[60].mxu1  ;;  %v1297_v38 = vmul.f32 %v1265_v2, %v4825_v54  ;;  %v3859_v30 = vpop.eup %3858  ;;  %v1314_v55 = vsub.f32 %v1282_v39, %v1298_v45 }
 0x68b   : > { %v2608_v4 = vmul.f32 %v3855_v61, %v3477_v25  ;;  %v2508_v52 = vpop.f32.mrb[61].mxu1  ;;  %v1299_v27 = vmul.f32 %v1267_v23, %v4842_v41 }
 0x68c   : > { %v2606_v47 = vmul.f32 %v3857_v34, %v2508_v52  ;;  %2676 = vperm.xlu1 %3626, %v4940_v48   ;;  %2681 = vperm.xlu0 %3620, %v2623_v5   ;;  %v3861_v48 = vpop.eup %3860  ;;  %v1313_v42 = vsub.f32 %v1281_v24, %v1297_v38 }
 0x68d   : > { %v2628_v15 = vmul.f32 %v2608_v4, %v1264_v0  ;;  %v2644_v1 = vmul.f32 %v2608_v4, %v1312_v37  ;;  %v1284_v0 = vld [vmem:[%s5091_s3 + $0x78] sm:$0x1f]  ;;  %v3863_v17 = vpop.eup %3862  ;;  %v1315_v44 = vsub.f32 %v1283_v49, %v1299_v27 }
 0x68e   : > { %v2627_v33 = vmul.f32 %v2606_v47, %v4948_v62  ;;  %v2643_v3 = vmul.f32 %v2606_v47, %v1311_v13  ;;  %v3480_v26 = vpop.f32.mrb[62].mxu1  ;;  %v3865_v12 = vpop.eup %3864  ;;  %v1316_v5 = vsub.f32 %v1284_v0, %v1300_v11 }
 0x68f   : > { %v2612_v57 = vmul.f32 %v3859_v30, %v3480_v26  ;;  %v2518_v46 = vpop.f32.mrb[63].mxu1 }
 0x690   : > { %v2610_v54 = vmul.f32 %v3861_v48, %v2518_v46  ;;  %2756 = vperm.xlu1 %3626, %v4942_v8   ;;  %2761 = vperm.xlu0 %3620, %v2639_v22  }
 0x691   : > { %v2630_v62 = vmul.f32 %v2612_v57, %v1266_v40  ;;  %v2646_v19 = vmul.f32 %v2612_v57, %v1314_v55 }
 0x692   : > { %v2629_v20 = vmul.f32 %v2610_v54, %v1265_v2  ;;  %v2645_v32 = vmul.f32 %v2610_v54, %v1313_v42  ;;  %v3483_v28 = vpop.f32.mrb[64].mxu1 }
 0x693   : > { %v2616_v8 = vmul.f32 %v3863_v17, %v3483_v28  ;;  %v2528_v22 = vpop.f32.mrb[65].mxu1 }
 0x694   : > { %v2614_v60 = vmul.f32 %v3865_v12, %v2528_v22  ;;  %2686 = vperm.xlu1 %3626, %v4960_v53   ;;  %2691 = vperm.xlu0 %3620, %v2625_v35  }
 0x695   : > { %v2632_v41 = vmul.f32 %v2616_v8, %v1268_v43  ;;  %v2648_v14 = vmul.f32 %v2616_v8, %v1316_v5 }
 0x696   : > { %v2631_v50 = vmul.f32 %v2614_v60, %v1267_v23  ;;  %v2647_v9 = vmul.f32 %v2614_v60, %v1315_v44 }
 0x698   : > { %2766 = vperm.xlu1 %3626, %v4962_v58   ;;  %2771 = vperm.xlu0 %3620, %v2641_v16  }
 0x69c   : > { %2696 = vperm.xlu1 %3626, %v2626_v56   ;;  %2701 = vperm.xlu0 %3620, %v2627_v33  }
 0x6a0   : > { %2776 = vperm.xlu1 %3626, %v2642_v21   ;;  %2781 = vperm.xlu0 %3620, %v2643_v3  }
 0x6a4   : > { %2706 = vperm.xlu1 %3626, %v2628_v15   ;;  %2711 = vperm.xlu0 %3620, %v2629_v20  }
 0x6a8   : > { %2786 = vperm.xlu1 %3626, %v2644_v1   ;;  %2791 = vperm.xlu0 %3620, %v2645_v32  }
 0x6ac   : > { %2716 = vperm.xlu1 %3626, %v2630_v62   ;;  %2721 = vperm.xlu0 %3620, %v2631_v50  }
 0x6b0   : > { %2796 = vperm.xlu1 %3626, %v2646_v19   ;;  %2801 = vperm.xlu0 %3620, %v2647_v9  }
 0x6b4   : > { %2726 = vperm.xlu1 %3626, %v2632_v41  }
 0x6b8   : > { %2806 = vperm.xlu1 %3626, %v2648_v14  }
 0x6f7   : > { %v2657_v53 = vpop.permute.xlu0 %2656  ;;  %v2737_v58 = vpop.permute.xlu1 %2736 }
 0x6f8   : > { %v2810_v31 = vsel %vm1321_vm3, %v2657_v53, %v2737_v58 }
 0x6f9   : > { %2826 = vst.msk [vmem:[%s5014_s13 + $0x8] sm:$0xff] %vm1563_vm4, %v2810_v31 }
 0x6fb   : > { %v2732_v10 = vpop.permute.xlu0 %2731  ;;  %v2652_v40 = vpop.permute.xlu1 %2651 }
 0x6fc   : > { %v2809_v63 = vsel %vm1321_vm3, %v2652_v40, %v2732_v10 }
 0x6fd   : > { %2825 = vst.msk [vmem:[%s5014_s13] sm:$0xff] %vm1563_vm4, %v2809_v63 }
 0x6ff   : > { %v2742_v18 = vpop.permute.xlu0 %2741  ;;  %v2667_v29 = vpop.permute.xlu1 %2666 }
 0x703   : > { %v2672_v7 = vpop.permute.xlu0 %2671  ;;  %v2747_v2 = vpop.permute.xlu1 %2746 }
 0x704   : > { %v2812_v51 = vsel %vm1321_vm3, %v2667_v29, %v2747_v2 }
 0x705   : > { %2828 = vst.msk [vmem:[%s5014_s13 + $0x18] sm:$0xff] %vm1563_vm4, %v2812_v51 }
 0x707   : > { %v2752_v36 = vpop.permute.xlu0 %2751  ;;  %v2662_v56 = vpop.permute.xlu1 %2661 }
 0x708   : > { %v2813_v21 = vsel %vm1321_vm3, %v2672_v7, %v2752_v36  ;;  %v2811_v59 = vsel %vm1321_vm3, %v2662_v56, %v2742_v18 }
 0x709   : > { %2829 = vst.msk [vmem:[%s5014_s13 + $0x20] sm:$0xff] %vm1563_vm4, %v2813_v21  ;;  %2827 = vst.msk [vmem:[%s5014_s13 + $0x10] sm:$0xff] %vm1563_vm4, %v2811_v59 }
 0x70b   : > { %v2682_v61 = vpop.permute.xlu0 %2681  ;;  %v2677_v35 = vpop.permute.xlu1 %2676 }
 0x70f   : > { %v2762_v16 = vpop.permute.xlu0 %2761  ;;  %v2757_v25 = vpop.permute.xlu1 %2756 }
 0x710   : > { %v2815_v13 = vsel %vm1321_vm3, %v2682_v61, %v2762_v16  ;;  %v2814_v34 = vsel %vm1321_vm3, %v2677_v35, %v2757_v25 }
 0x711   : > { %2831 = vst.msk [vmem:[%s5014_s13 + $0x30] sm:$0xff] %vm1563_vm4, %v2815_v13  ;;  %2830 = vst.msk [vmem:[%s5014_s13 + $0x28] sm:$0xff] %vm1563_vm4, %v2814_v34 }
 0x713   : > { %v2692_v37 = vpop.permute.xlu0 %2691  ;;  %v2687_v4 = vpop.permute.xlu1 %2686 }
 0x717   : > { %v2772_v52 = vpop.permute.xlu0 %2771  ;;  %v2767_v45 = vpop.permute.xlu1 %2766 }
 0x718   : > { %v2817_v43 = vsel %vm1321_vm3, %v2692_v37, %v2772_v52  ;;  %v2816_v47 = vsel %vm1321_vm3, %v2687_v4, %v2767_v45 }
 0x719   : > { %2833 = vst.msk [vmem:[%s5014_s13 + $0x40] sm:$0xff] %vm1563_vm4, %v2817_v43  ;;  %2832 = vst.msk [vmem:[%s5014_s13 + $0x38] sm:$0xff] %vm1563_vm4, %v2816_v47 }
 0x71b   : > { %v2702_v39 = vpop.permute.xlu0 %2701  ;;  %v2697_v38 = vpop.permute.xlu1 %2696 }
 0x71f   : > { %v2782_v23 = vpop.permute.xlu0 %2781  ;;  %v2777_v15 = vpop.permute.xlu1 %2776 }
 0x720   : > { %v2819_v1 = vsel %vm1321_vm3, %v2702_v39, %v2782_v23  ;;  %v2818_v24 = vsel %vm1321_vm3, %v2697_v38, %v2777_v15 }
 0x721   : > { %2835 = vst.msk [vmem:[%s5014_s13 + $0x50] sm:$0xff] %vm1563_vm4, %v2819_v1  ;;  %2834 = vst.msk [vmem:[%s5014_s13 + $0x48] sm:$0xff] %vm1563_vm4, %v2818_v24 }
 0x723   : > { %v2712_v30 = vpop.permute.xlu0 %2711  ;;  %v2707_v33 = vpop.permute.xlu1 %2706 }
 0x727   : > { %v2792_v3 = vpop.permute.xlu0 %2791  ;;  %v2787_v26 = vpop.permute.xlu1 %2786 }
 0x728   : > { %v2821_v48 = vsel %vm1321_vm3, %v2712_v30, %v2792_v3  ;;  %v2820_v55 = vsel %vm1321_vm3, %v2707_v33, %v2787_v26 }
 0x729   : > { %2837 = vst.msk [vmem:[%s5014_s13 + $0x60] sm:$0xff] %vm1563_vm4, %v2821_v48  ;;  %2836 = vst.msk [vmem:[%s5014_s13 + $0x58] sm:$0xff] %vm1563_vm4, %v2820_v55 }
 0x72b   : > { %v2717_v57 = vpop.permute.xlu1 %2716  ;;  %v2722_v46 = vpop.permute.xlu0 %2721 }
 0x72f   : > { %v2797_v11 = vpop.permute.xlu1 %2796  ;;  %v2802_v42 = vpop.permute.xlu0 %2801 }
 0x730   : > { %v2822_v54 = vsel %vm1321_vm3, %v2717_v57, %v2797_v11  ;;  %v2823_v0 = vsel %vm1321_vm3, %v2722_v46, %v2802_v42 }
 0x731   : > { %2838 = vst.msk [vmem:[%s5014_s13 + $0x68] sm:$0xff] %vm1563_vm4, %v2822_v54  ;;  %2839 = vst.msk [vmem:[%s5014_s13 + $0x70] sm:$0xff] %vm1563_vm4, %v2823_v0 }
 0x733   : > { %v2727_v27 = vpop.permute.xlu1 %2726 }
 0x737   : > { %v2807_v62 = vpop.permute.xlu1 %2806 }
 0x738   : > { %v2824_v19 = vsel %vm1321_vm3, %v2727_v27, %v2807_v62 }
 0x739   : > { %2841 = vst.msk [vmem:[%s5014_s13 + $0x78] sm:$0x1f] %vm2840_vm13, %v2824_v19 }
 0x73a PF: > { %s18_s29 = sadd.s32 1, %s3888_s29   ;;  %s5157_s27 = smov %s3884_s28 }
 0x73b   : > { %p15_p5 = scmp.ge.s32.totalorder %s18_s29, 6   ;;  %s5158_s28 = smov %s5160_s30 }
 0x73d   :  { %17 = sbr.rel (!%p15_p5) target bundleno = 2 (0x2), region = 90 }

</bundles_post_ra>
